<compile_context>
chip_gen: v5e
topology: v5e:2x2
jax: 0.10.0
libtpu: 0.0.40
codegen_flags: <defaults>
</compile_context>

<pallas_src>
import functools

import numpy as np
import jax
import jax.numpy as jnp
from jax import lax
from jax.experimental import pallas as pl
from jax.experimental.pallas import tpu as pltpu

_PID_SENTINEL = 2147483647  # int32 max: noise / padded pid slots; sorts last


def _round_up(a, b):
    return (a + b - 1) // b * b


def _condensation_kernel(radius_threshold, n_real_tiles,
                         side_ref, x_ref, xat_ref, cps_ref, pids_ref,
                         out_ref):
    """One [TN, D] hit tile against all P condensation points.

    side_ref columns: 0 = q, 1 = attractive mask (0/1), 2 = ||x||^2 (centered),
                      3 = particle id bit-cast to f32.
    out_ref is a [1, 2, P] per-pid partial-sum block (row 0 = attractive,
    row 1 = repulsive), resident across the inner (reduction) grid axis.
    """
    i = pl.program_id(1)

    @pl.when(i == 0)
    def _():
        out_ref[...] = jnp.zeros_like(out_ref)

    tile_flat = pl.program_id(0) * pl.num_programs(1) + i

    @pl.when(tile_flat < n_real_tiles)          # skip all-padding tiles
    def _():
        x = x_ref[...]                                     # [TN, D] f32
        q = side_ref[:, 0:1]                               # [TN, 1]
        hit_mask = side_ref[:, 1:2] > 0.0                  # [TN, 1] bool
        x2 = side_ref[:, 2:3]                              # [TN, 1]
        pid = pltpu.bitcast(side_ref[:, 3:4], jnp.int32)   # [TN, 1]
        xat = xat_ref[...]                                 # [D, P]
        qa = cps_ref[0:1, :]                               # [1, P]
        xa2 = cps_ref[1:2, :]                              # [1, P]
        pids = pids_ref[...]                               # [1, P] int32

        # Squared Euclidean distance via the MXU: ||x||^2 + ||xa||^2 - 2 x.xa.
        xdot = jnp.dot(x, xat, preferred_element_type=jnp.float32)   # [TN, P]
        d2 = jnp.maximum(x2 + xa2 - 2.0 * xdot, 0.0)
        dist = jnp.sqrt(d2)

        same = pid == pids                                 # [TN, P] bool
        w = q * qa                                         # shared broadcast mult
        va = jnp.where(same & hit_mask, w * d2, 0.0)
        vr = jnp.where(same, 0.0,
                       w * jnp.maximum(radius_threshold - dist, 0.0))

        acc = jnp.concatenate([jnp.sum(va, axis=0, keepdims=True),
                               jnp.sum(vr, axis=0, keepdims=True)], axis=0)
        out_ref[...] += acc[None]                          # [1, 2, P]


@functools.partial(jax.jit, static_argnums=(6, 7, 8, 9, 10, 11))
def _potential_loss_impl(beta, x, particle_id, reconstructable, track_params,
                         ec_hit_mask, q_min, radius_threshold, attr_pt_thld,
                         p_max, tile_n, n_splits):
    n_ec, d = x.shape
    p = _round_up(max(int(p_max), 1), 128)        # lane-dense pid capacity

    # Edge-classifier hit mask: order-preserving gather with static output size
    # (beta/x already carry the masked length, as in the PyTorch module).
    # TODO(synk): assumes sum(ec_hit_mask) == len(beta); fewer True entries
    # silently duplicate hit 0, more are truncated (jit needs a static size).
    (ec_idx,) = jnp.nonzero(ec_hit_mask, size=n_ec)
    particle_id = particle_id[ec_idx].astype(jnp.int32)
    reconstructable = reconstructable[ec_idx]
    track_params = track_params[ec_idx]

    mask = (reconstructable > 0) & (track_params > attr_pt_thld)
    n_masked = jnp.sum(mask).astype(jnp.float32)
    # TODO(synk): the PyTorch module host-asserts mask.sum() > 0 and
    # len(pids) > 0; those host syncs are dropped to keep this jittable
    # (n_masked == 0 would yield inf/nan exactly like an unchecked division).

    beta = jnp.clip(beta.astype(jnp.float32), 0.0, 1.0 - 1e-7)  # arctanh(1)=inf
    q = jnp.arctanh(beta) ** 2 + q_min                          # [N]

    # Unique positive pids padded to static lane width p.  Noise (pid <= 0)
    # maps to INT32_MAX so the padded/sorted pid array stays sorted and
    # searchsorted yields a dense segment index in O(N log P).
    # TODO(synk): events with more than p real particle ids are truncated.
    pid_mapped = jnp.where(particle_id > 0, particle_id, _PID_SENTINEL)
    pids = jnp.unique(pid_mapped, size=p,
                      fill_value=_PID_SENTINEL).astype(jnp.int32)   # [P] sorted
    valid = pids != _PID_SENTINEL

    # Condensation point (max-q hit) per pid via O(N) segment reductions
    # (replaces the previous O(N*P) pid_masks + argmax prologue).
    dense = jnp.minimum(jnp.searchsorted(pids, pid_mapped), p - 1).astype(jnp.int32)
    seg_qmax = jax.ops.segment_max(q, dense, num_segments=p)           # [P]
    hit_idx = jnp.arange(n_ec, dtype=jnp.int32)
    is_alpha = q >= seg_qmax[dense]
    alphas = jax.ops.segment_min(jnp.where(is_alpha, hit_idx, n_ec),
                                 dense, num_segments=p)
    alphas = jnp.minimum(alphas, n_ec - 1)                              # empty slots

    # Center coordinates (distances are translation invariant) to limit f32
    # cancellation in the ||x||^2 + ||xa||^2 - 2 x.xa expansion.
    x = x.astype(jnp.float32)
    x_c = x - jnp.mean(x, axis=0, keepdims=True)
    x_alphas = jnp.where(valid[:, None], x_c[alphas], 0.0)              # [P, D]
    q_alphas = jnp.where(valid, q[alphas], 0.0)                         # [P]
    xat = x_alphas.T                                                    # [D, P]
    xa2 = jnp.sum(x_alphas * x_alphas, axis=1)                          # [P]
    cps = jnp.stack([q_alphas, xa2], axis=0)                            # [2, P]

    # Per-hit side columns packed into one [N, 4] block (single per-step DMA):
    # q, attractive mask, ||x||^2, pid bit-cast to f32.
    x2 = jnp.sum(x_c * x_c, axis=1)
    pid_bits = lax.bitcast_convert_type(particle_id, jnp.float32)
    side = jnp.stack([q, mask.astype(jnp.float32), x2, pid_bits], axis=1)

    # Tile sizing: shrink tile_n for small events so there is (almost) no
    # whole-tile padding; remaining all-padding tiles are skipped in-kernel.
    tile = max(128, min(_round_up(int(tile_n), 128), _round_up(n_ec, 128)))
    chunk = n_splits * tile
    n_tot = _round_up(n_ec, chunk)
    tiles_per_split = n_tot // chunk
    n_real_tiles = -(-n_ec // tile)               # static: shapes are static

    x_p = jnp.pad(x_c, ((0, n_tot - n_ec), (0, 0)))
    side_p = jnp.pad(side, ((0, n_tot - n_ec), (0, 0)))   # padded hits: q = 0

    kernel = functools.partial(_condensation_kernel,
                               float(radius_threshold), int(n_real_tiles))
    row_idx = lambda c, i: (c * tiles_per_split + i, 0)
    const_idx = lambda c, i: (0, 0)

    out = pl.pallas_call(
        kernel,
        out_shape=jax.ShapeDtypeStruct((n_splits, 2, p), jnp.float32),
        grid_spec=pltpu.PrefetchScalarGridSpec(
            num_scalar_prefetch=0,
            grid=(n_splits, tiles_per_split),
            in_specs=[
                pl.BlockSpec((tile, 4), row_idx),     # q / mask / ||x||^2 / pid
                pl.BlockSpec((tile, d), row_idx),     # centered coords
                pl.BlockSpec((d, p), const_idx),      # x_alphas^T   [D, P]
                pl.BlockSpec((2, p), const_idx),      # q_alpha, ||x_alpha||^2
                pl.BlockSpec((1, p), const_idx),      # unique pids (int32)
            ],
            out_specs=pl.BlockSpec((1, 2, p), lambda c, i: (c, 0, 0)),
        ),
        compiler_params=pltpu.CompilerParams(
            dimension_semantics=("parallel", "arbitrary")),
    )(side_p, x_p, xat, cps, pids[None, :])

    return {
        "attractive": jnp.sum(out[:, 0, :]) / n_masked,          # mean over masked hits
        "repulsive": jnp.sum(out[:, 1, :]) / jnp.float32(n_ec),  # mean over all hits
    }


def _tpu_defaults():
    """(tile_n, n_splits) per TPU generation; conservative fallback elsewhere."""
    kind = ""
    try:
        dev = jax.devices()[0]
        if dev.platform == "tpu":
            kind = dev.device_kind.lower()
    except Exception:
        pass
    if "v7" in kind:
        return 2048, 2    # two TensorCores/chip -> keep the parallel split axis
    if "v5" in kind:
        return 1024, 1    # v5e: 16 MiB scoped-VMEM default, single TC
    return 2048, 1        # v6e (and default): single TC, 32 MiB scoped VMEM


def potential_loss(*, beta, x, particle_id, reconstructable, track_params,
                   ec_hit_mask, q_min=0.01, radius_threshold=10.0,
                   attr_pt_thld=0.9, p_max=128, tile_n=None, n_splits=None):
    dflt_tile, dflt_splits = _tpu_defaults()
    tile_n = dflt_tile if tile_n is None else int(tile_n)
    n_splits = dflt_splits if n_splits is None else int(n_splits)
    return _potential_loss_impl(beta, x, particle_id, reconstructable,
                                track_params, ec_hit_mask,
                                float(q_min), float(radius_threshold),
                                float(attr_pt_thld),
                                int(p_max), tile_n, n_splits)


def _reference(beta, x, particle_id, reconstructable, track_params, ec_hit_mask,
               q_min=0.01, radius_threshold=10.0, attr_pt_thld=0.9):
    """Pure-JAX mirror of the PyTorch forward, for correctness checking."""
    particle_id = particle_id[ec_hit_mask]
    reconstructable = reconstructable[ec_hit_mask]
    track_params = track_params[ec_hit_mask]
    mask = (reconstructable > 0) & (track_params > attr_pt_thld)
    pids = jnp.unique(particle_id[particle_id > 0])
    pid_masks = particle_id[:, None] == pids[None, :]
    q = jnp.arctanh(beta) ** 2 + q_min
    alphas = jnp.argmax(q[:, None] * pid_masks, axis=0)
    x_alphas = x[alphas]
    q_alphas = q[alphas][None, :]
    dist = jnp.sqrt(jnp.sum((x[:, None, :] - x_alphas[None, :, :]) ** 2, axis=-1))
    va = q[:, None] * pid_masks * jnp.square(dist) * q_alphas
    vr = q[:, None] * (~pid_masks) * jnp.maximum(radius_threshold - dist, 0.0) * q_alphas
    return {"attractive": jnp.sum(jnp.mean(va[mask], axis=0)),
            "repulsive": jnp.sum(jnp.mean(vr, axis=0))}


if __name__ == "__main__":
    key = jax.random.PRNGKey(0)
    k1, k2, k3, k4, k5, k6 = jax.random.split(key, 6)

    n_total = 320        # hits before the edge-classifier mask
    n_ec = 256           # hits surviving ec_hit_mask (length of beta / x)
    d = 8                # condensation (cluster) space dimension
    n_particles = 12     # particle ids in {0..12}, 0 == noise

    perm = jax.random.permutation(k1, n_total)
    ec_hit_mask = jnp.zeros((n_total,), dtype=bool).at[perm[:n_ec]].set(True)

    beta = jax.random.uniform(k2, (n_ec,), minval=0.01, maxval=0.9,
                              dtype=jnp.float32)
    x = jax.random.normal(k3, (n_ec, d), dtype=jnp.float32)
    particle_id = jax.random.randint(k4, (n_total,), 0, n_particles + 1).astype(jnp.int32)
    reconstructable = jax.random.randint(k5, (n_total,), 0, 2).astype(jnp.int32)
    track_params = jax.random.uniform(k6, (n_total,), minval=0.0, maxval=2.0,
                                      dtype=jnp.float32)

    out = potential_loss(beta=beta, x=x, particle_id=particle_id,
                         reconstructable=reconstructable,
                         track_params=track_params, ec_hit_mask=ec_hit_mask)
    jax.block_until_ready(out)

    ref = _reference(beta, x, particle_id, reconstructable, track_params, ec_hit_mask)
    np.testing.assert_allclose(np.asarray(out["attractive"]),
                               np.asarray(ref["attractive"]), rtol=2e-3, atol=1e-3)
    np.testing.assert_allclose(np.asarray(out["repulsive"]),
                               np.asarray(ref["repulsive"]), rtol=2e-3, atol=1e-3)
    print("KERNEL_OK")
</pallas_src>

<mosaic_0001>
module attributes {stable_mosaic.version = 11 : i64} {
  func.func @_condensation_kernel(%arg0: i32, %arg1: i32, %arg2: memref<256x4xf32, #tpu.memory_space<vmem>>, %arg3: memref<256x8xf32, #tpu.memory_space<vmem>>, %arg4: memref<8x128xf32, #tpu.memory_space<vmem>>, %arg5: memref<2x128xf32, #tpu.memory_space<vmem>>, %arg6: memref<1x128xi32, #tpu.memory_space<vmem>>, %arg7: memref<1x2x128xf32, #tpu.memory_space<vmem>>) attributes {dimension_semantics = [#tpu.dimension_semantics<parallel>, #tpu.dimension_semantics<arbitrary>], iteration_bounds = array<i64: 1, 1>, scalar_prefetch = 0 : i64, scratch_operands = 0 : i64, tpu.core_type = #tpu.core_type<tc>, window_params = [{transform_indices = @transform_0, window_bounds = array<i64: 256, 4>}, {transform_indices = @transform_1, window_bounds = array<i64: 256, 8>}, {pipeline_mode = #tpu.pipeline_mode<synchronous>, transform_indices = @transform_2, window_bounds = array<i64: 8, 128>}, {pipeline_mode = #tpu.pipeline_mode<synchronous>, transform_indices = @transform_3, window_bounds = array<i64: 2, 128>}, {pipeline_mode = #tpu.pipeline_mode<synchronous>, transform_indices = @transform_4, window_bounds = array<i64: 1, 128>}, {transform_indices = @transform_5, window_bounds = array<i64: 1, 2, 128>}]} {
    %c0_i32 = arith.constant 0 : i32
    %0 = arith.cmpi eq, %arg1, %c0_i32 : i32
    %1 = arith.extui %0 : i1 to i32
    %c0_i32_0 = arith.constant 0 : i32
    %2 = arith.cmpi ne, %1, %c0_i32_0 : i32
    scf.if %2 {
      %cst = arith.constant 0.000000e+00 : f32
      %8 = vector.broadcast %cst : f32 to vector<1x2x128xf32>
      %c0 = arith.constant 0 : index
      %c0_3 = arith.constant 0 : index
      %c0_4 = arith.constant 0 : index
      %9 = vector.load %arg7[%c0, %c0_3, %c0_4] : memref<1x2x128xf32, #tpu.memory_space<vmem>>, vector<1x2x128xf32>
      tpu.vector_store %arg7[%c0, %c0_3, %c0_4], %8 {strides = array<i32>} : memref<1x2x128xf32, #tpu.memory_space<vmem>>, vector<1x2x128xf32>,
    } else {
    }
    %c1_i32 = arith.constant 1 : i32
    %3 = arith.muli %arg0, %c1_i32 : i32
    %4 = arith.addi %3, %arg1 : i32
    %c1_i32_1 = arith.constant 1 : i32
    %5 = arith.cmpi slt, %4, %c1_i32_1 : i32
    %6 = arith.extui %5 : i1 to i32
    %c0_i32_2 = arith.constant 0 : i32
    %7 = arith.cmpi ne, %6, %c0_i32_2 : i32
    scf.if %7 {
      %c0 = arith.constant 0 : index
      %c0_3 = arith.constant 0 : index
      %8 = vector.load %arg3[%c0, %c0_3] : memref<256x8xf32, #tpu.memory_space<vmem>>, vector<256x8xf32>
      %c0_4 = arith.constant 0 : index
      %c0_5 = arith.constant 0 : index
      %9 = vector.load %arg2[%c0_4, %c0_5] : memref<256x4xf32, #tpu.memory_space<vmem>>, vector<256x1xf32>
      %c0_6 = arith.constant 0 : index
      %c1 = arith.constant 1 : index
      %10 = vector.load %arg2[%c0_6, %c1] : memref<256x4xf32, #tpu.memory_space<vmem>>, vector<256x1xf32>
      %cst = arith.constant 0.000000e+00 : f32
      %11 = vector.broadcast %cst : f32 to vector<256x1xf32>
      %12 = arith.cmpf ogt, %10, %11 : vector<256x1xf32>
      %c0_7 = arith.constant 0 : index
      %c2 = arith.constant 2 : index
      %13 = vector.load %arg2[%c0_7, %c2] : memref<256x4xf32, #tpu.memory_space<vmem>>, vector<256x1xf32>
      %c0_8 = arith.constant 0 : index
      %c3 = arith.constant 3 : index
      %14 = vector.load %arg2[%c0_8, %c3] : memref<256x4xf32, #tpu.memory_space<vmem>>, vector<256x1xf32>
      %15 = tpu.bitcast %14 : vector<256x1xf32> -> vector<256x1xi32>
      %c0_9 = arith.constant 0 : index
      %c0_10 = arith.constant 0 : index
      %16 = vector.load %arg4[%c0_9, %c0_10] : memref<8x128xf32, #tpu.memory_space<vmem>>, vector<8x128xf32>
      %c0_11 = arith.constant 0 : index
      %c0_12 = arith.constant 0 : index
      %17 = vector.load %arg5[%c0_11, %c0_12] : memref<2x128xf32, #tpu.memory_space<vmem>>, vector<1x128xf32>
      %c1_13 = arith.constant 1 : index
      %c0_14 = arith.constant 0 : index
      %18 = vector.load %arg5[%c1_13, %c0_14] : memref<2x128xf32, #tpu.memory_space<vmem>>, vector<1x128xf32>
      %c0_15 = arith.constant 0 : index
      %c0_16 = arith.constant 0 : index
      %19 = vector.load %arg6[%c0_15, %c0_16] : memref<1x128xi32, #tpu.memory_space<vmem>>, vector<1x128xi32>
      %cst_17 = arith.constant dense<0.000000e+00> : vector<256x128xf32>
      %20 = tpu.matmul %8, %16, %cst_17 {dimension_numbers = #tpu.dot_dimension_numbers<[1], [0], [0], [1], [0, 0, 1, 1], [], []>} : vector<256x8xf32>, vector<8x128xf32>, vector<256x128xf32> -> vector<256x128xf32>
      %21 = vector.broadcast %13 : vector<256x1xf32> to vector<256x128xf32>
      %22 = vector.broadcast %18 : vector<1x128xf32> to vector<256x128xf32>
      %23 = arith.addf %21, %22 : vector<256x128xf32>
      %cst_18 = arith.constant 2.000000e+00 : f32
      %24 = vector.broadcast %cst_18 : f32 to vector<256x128xf32>
      %25 = arith.mulf %24, %20 : vector<256x128xf32>
      %26 = arith.subf %23, %25 : vector<256x128xf32>
      %cst_19 = arith.constant 0.000000e+00 : f32
      %27 = vector.broadcast %cst_19 : f32 to vector<256x128xf32>
      %28 = arith.maximumf %26, %27 : vector<256x128xf32>
      %29 = math.sqrt %28 : vector<256x128xf32>
      %30 = vector.broadcast %15 : vector<256x1xi32> to vector<256x128xi32>
      %31 = vector.broadcast %19 : vector<1x128xi32> to vector<256x128xi32>
      %32 = arith.cmpi eq, %30, %31 : vector<256x128xi32>
      %33 = vector.broadcast %9 : vector<256x1xf32> to vector<256x128xf32>
      %34 = vector.broadcast %17 : vector<1x128xf32> to vector<256x128xf32>
      %35 = arith.mulf %33, %34 : vector<256x128xf32>
      %36 = vector.broadcast %12 : vector<256x1xi1> to vector<256x128xi1>
      %37 = arith.andi %32, %36 : vector<256x128xi1>
      %38 = arith.mulf %35, %28 : vector<256x128xf32>
      %cst_20 = arith.constant 0.000000e+00 : f32
      %39 = vector.broadcast %cst_20 : f32 to vector<256x128xf32>
      %40 = arith.select %37, %38, %39 : vector<256x128xi1>, vector<256x128xf32>
      %cst_21 = arith.constant 1.000000e+01 : f32
      %41 = vector.broadcast %cst_21 : f32 to vector<256x128xf32>
      %42 = arith.subf %41, %29 : vector<256x128xf32>
      %cst_22 = arith.constant 0.000000e+00 : f32
      %43 = vector.broadcast %cst_22 : f32 to vector<256x128xf32>
      %44 = arith.maximumf %42, %43 : vector<256x128xf32>
      %45 = arith.mulf %35, %44 : vector<256x128xf32>
      %cst_23 = arith.constant 0.000000e+00 : f32
      %46 = vector.broadcast %cst_23 : f32 to vector<256x128xf32>
      %47 = arith.select %32, %46, %45 : vector<256x128xi1>, vector<256x128xf32>
      %cst_24 = arith.constant dense<0.000000e+00> : vector<128xf32>
      %48 = vector.multi_reduction <add>, %40, %cst_24 [0] : vector<256x128xf32> to vector<128xf32>
      %49 = vector.shape_cast %48 : vector<128xf32> to vector<1x128xf32>
      %cst_25 = arith.constant dense<0.000000e+00> : vector<128xf32>
      %50 = vector.multi_reduction <add>, %47, %cst_25 [0] : vector<256x128xf32> to vector<128xf32>
      %51 = vector.shape_cast %50 : vector<128xf32> to vector<1x128xf32>
      %52 = tpu.concatenate %49, %51 in 0 : vector<1x128xf32>, vector<1x128xf32> -> vector<2x128xf32>
      %c0_26 = arith.constant 0 : index
      %c0_27 = arith.constant 0 : index
      %c0_28 = arith.constant 0 : index
      %53 = vector.load %arg7[%c0_26, %c0_27, %c0_28] : memref<1x2x128xf32, #tpu.memory_space<vmem>>, vector<1x2x128xf32>
      %54 = vector.shape_cast %52 : vector<2x128xf32> to vector<1x2x128xf32>
      %55 = arith.addf %53, %54 : vector<1x2x128xf32>
      %c0_29 = arith.constant 0 : index
      %c0_30 = arith.constant 0 : index
      %c0_31 = arith.constant 0 : index
      %56 = vector.load %arg7[%c0_29, %c0_30, %c0_31] : memref<1x2x128xf32, #tpu.memory_space<vmem>>, vector<1x2x128xf32>
      tpu.vector_store %arg7[%c0_29, %c0_30, %c0_31], %55 {strides = array<i32>} : memref<1x2x128xf32, #tpu.memory_space<vmem>>, vector<1x2x128xf32>,
    } else {
    }
    return
  }
  func.func @transform_0(%arg0: i32, %arg1: i32) -> (i32, i32) {
    %c1_i32 = arith.constant 1 : i32
    %0 = arith.muli %arg0, %c1_i32 : i32
    %1 = arith.addi %0, %arg1 : i32
    %c0_i32 = arith.constant 0 : i32
    %c0_i32_0 = arith.constant 0 : i32
    return %1, %c0_i32 : i32, i32
  }
  func.func @transform_1(%arg0: i32, %arg1: i32) -> (i32, i32) {
    %c1_i32 = arith.constant 1 : i32
    %0 = arith.muli %arg0, %c1_i32 : i32
    %1 = arith.addi %0, %arg1 : i32
    %c0_i32 = arith.constant 0 : i32
    %c0_i32_0 = arith.constant 0 : i32
    return %1, %c0_i32 : i32, i32
  }
  func.func @transform_2(%arg0: i32, %arg1: i32) -> (i32, i32) {
    %c0_i32 = arith.constant 0 : i32
    %c0_i32_0 = arith.constant 0 : i32
    %c0_i32_1 = arith.constant 0 : i32
    return %c0_i32, %c0_i32_0 : i32, i32
  }
  func.func @transform_3(%arg0: i32, %arg1: i32) -> (i32, i32) {
    %c0_i32 = arith.constant 0 : i32
    %c0_i32_0 = arith.constant 0 : i32
    %c0_i32_1 = arith.constant 0 : i32
    return %c0_i32, %c0_i32_0 : i32, i32
  }
  func.func @transform_4(%arg0: i32, %arg1: i32) -> (i32, i32) {
    %c0_i32 = arith.constant 0 : i32
    %c0_i32_0 = arith.constant 0 : i32
    %c0_i32_1 = arith.constant 0 : i32
    return %c0_i32, %c0_i32_0 : i32, i32
  }
  func.func @transform_5(%arg0: i32, %arg1: i32) -> (i32, i32, i32) {
    %c0_i32 = arith.constant 0 : i32
    %c0_i32_0 = arith.constant 0 : i32
    %c0_i32_1 = arith.constant 0 : i32
    return %arg0, %c0_i32, %c0_i32_0 : i32, i32, i32
  }
}

</mosaic_0001>

<bundles_post_ra>
// kernel: custom-call.1
= control target key start
LH: loop header
LB: loop body
LE: loop exit
PB: predicated region body
PF: predicated region fallthrough
CT: control target
= control target key end

     0   :  { %s6_s0 = inlined_call_operand.vmem [shape: u32[256], index: 0, kind: output, shape index: {}]  }

// kernel: _potential_loss_impl.1
= control target key start
LH: loop header
LB: loop body
LE: loop exit
PB: predicated region body
PF: predicated region fallthrough
CT: control target
= control target key end

     0   :  { %v1979_v0 = vmov 2   ;;  %vm206_vm0 = vcmask 64512   ;;  %s4117_s2 = inlined_call_operand.vmem [shape: f32[8,128], index: 2, kind: input, shape index: {}]   ;;  %s4118_s0 = inlined_call_operand.vmem [shape: f32[256,4], index: 0, kind: input, shape index: {}]   ;;  %s4119_s1 = inlined_call_operand.vmem [shape: f32[256,8], index: 1, kind: input, shape index: {}]   ;;  %s4120_s3 = inlined_call_operand.vmem [shape: f32[2,128], index: 3, kind: input, shape index: {}]   ;;  %s4121_s4 = inlined_call_operand.vmem [shape: s32[1,128], index: 4, kind: input, shape index: {}]   ;;  %s4122_s5 = inlined_call_operand.vmem [shape: f32[1,2,128], index: 5, kind: output, shape index: {}]  }
   0x1   :  { %1868 = vset.pattern.permute.xlu2 %v1979_v0  ;;  %1867 = vset.pattern.permute.xlu1 %v1979_v0  ;;  %v202_v1 = vld [vmem:[%s4117_s2] sm:$0xff]  ;;  %v2025_v3 = vld [vmem:[%s4118_s0 + $0x10] sm:$0xff]  ;;  %v2054_v9 = vld [vmem:[%s4118_s0 + $0x28] sm:$0xff] }
   0x2   :  { %v2020_v2 = vld [vmem:[%s4118_s0 + $0x20] sm:$0xff]  ;;  %1866 = vset.pattern.permute.xlu0 %v1979_v0  ;;  %318 = vmatpush.msra.mxu0 %v202_v1  ;;  %v2059_v10 = vld [vmem:[%s4118_s0 + $0x18] sm:$0xff]  ;;  %v2064_v11 = vld [vmem:[%s4118_s0 + $0x8] sm:$0xff] }
   0x3   :  { %v2030_v4 = vld [vmem:[%s4118_s0] sm:$0xff]  ;;  %1858 = vmatpush.msra.mxu1 %v202_v1  ;;  %1859 = vmatpush.msra.mxu2 %v202_v1  ;;  %v75_v12 = vld [vmem:[%s4119_s1 + $0x8] sm:$0xff]  ;;  %v2093_v17 = vld [vmem:[%s4118_s0 + $0x38] sm:$0xff] }
   0x4   :  { %v74_v5 = vld [vmem:[%s4119_s1] sm:$0xff]  ;;  %1860 = vmatpush.msra.mxu3 %v202_v1  ;;  %433 = vperm.xlu2 %1868, %v2020_v2   ;;  %v83_v13 = vld [vmem:[%s4119_s1 + $0x48] sm:$0xff]  ;;  %v2098_v18 = vld [vmem:[%s4118_s0 + $0x30] sm:$0xff] }
   0x5   :  { %v82_v6 = vld [vmem:[%s4119_s1 + $0x40] sm:$0xff]  ;;  %425 = vperm.xlu1 %1867, %v2025_v3   ;;  %417 = vperm.xlu0 %1866, %v2030_v4   ;;  %v91_v14 = vld [vmem:[%s4119_s1 + $0x88] sm:$0xff]  ;;  %v76_v19 = vld [vmem:[%s4119_s1 + $0x10] sm:$0xff] }
   0x6   :  { %v90_v7 = vld [vmem:[%s4119_s1 + $0x80] sm:$0xff]  ;;  %1826 = vmatmul.msk.f32.vlgmr.msra.gmra.mxu0 %vm206_vm0, %v74_v5  ;;  %1834 = vmatmul.msk.f32.vlgmr.msra.gmra.mxu1 %vm206_vm0, %v82_v6  ;;  %v99_v15 = vld [vmem:[%s4119_s1 + $0xc8] sm:$0xff]  ;;  %v84_v20 = vld [vmem:[%s4119_s1 + $0x50] sm:$0xff]  ;;  %v1980_v5 = vmov 3  }
   0x7   :  { %v98_v8 = vld [vmem:[%s4119_s1 + $0xc0] sm:$0xff]  ;;  %1842 = vmatmul.msk.f32.vlgmr.msra.gmra.mxu2 %vm206_vm0, %v90_v7  ;;  %v92_v21 = vld [vmem:[%s4119_s1 + $0x90] sm:$0xff]  ;;  %v2122_v23 = vld [vmem:[%s4118_s0 + $0x58] sm:$0xff] }
   0x8   :  { %1850 = vmatmul.msk.f32.vlgmr.msra.gmra.mxu3 %vm206_vm0, %v98_v8  ;;  %v2088_v16 = vld [vmem:[%s4118_s0 + $0x40] sm:$0xff]  ;;  %v100_v22 = vld [vmem:[%s4119_s1 + $0xd0] sm:$0xff]  ;;  %v2132_v25 = vld [vmem:[%s4118_s0 + $0x48] sm:$0xff] }
   0x9   :  { %v2127_v24 = vld [vmem:[%s4118_s0 + $0x50] sm:$0xff]  ;;  %v77_v26 = vld [vmem:[%s4119_s1 + $0x18] sm:$0xff]  ;;  %v2161_v31 = vld [vmem:[%s4118_s0 + $0x68] sm:$0xff] }
   0xa   :  { %v85_v27 = vld [vmem:[%s4119_s1 + $0x58] sm:$0xff]  ;;  %v2156_v30 = vld [vmem:[%s4118_s0 + $0x70] sm:$0xff]  ;;  %v2166_v32 = vld [vmem:[%s4118_s0 + $0x60] sm:$0xff] }
   0xb   :  { %v93_v28 = vld [vmem:[%s4119_s1 + $0x98] sm:$0xff]  ;;  %v78_v33 = vld [vmem:[%s4119_s1 + $0x20] sm:$0xff]  ;;  %v2190_v37 = vld [vmem:[%s4118_s0 + $0x88] sm:$0xff] }
   0xc   :  { %437 = vperm.xlu2 %1868, %v2054_v9   ;;  %v101_v29 = vld [vmem:[%s4119_s1 + $0xd8] sm:$0xff]  ;;  %v86_v34 = vld [vmem:[%s4119_s1 + $0x60] sm:$0xff]  ;;  %4218 = vst [vmem:[#allocation2_spill] sm:$0xff] %v2190_v37  ;;  %v79_v40 = vld [vmem:[%s4119_s1 + $0x28] sm:$0xff] }
   0xd   :  { %429 = vperm.xlu1 %1867, %v2059_v10   ;;  %421 = vperm.xlu0 %1866, %v2064_v11   ;;  %v94_v35 = vld [vmem:[%s4119_s1 + $0xa0] sm:$0xff]  ;;  %v2200_v39 = vld [vmem:[%s4118_s0 + $0x78] sm:$0xff]  ;;  %v87_v41 = vld [vmem:[%s4119_s1 + $0x68] sm:$0xff] }
   0xe   :  { %1827 = vmatmul.msk.f32.gmra.mxu0 %vm206_vm0, %v75_v12  ;;  %1835 = vmatmul.msk.f32.gmra.mxu1 %vm206_vm0, %v83_v13  ;;  %v102_v36 = vld [vmem:[%s4119_s1 + $0xe0] sm:$0xff]  ;;  %v95_v42 = vld [vmem:[%s4119_s1 + $0xa8] sm:$0xff]  ;;  %v2229_v45 = vld [vmem:[%s4118_s0 + $0x98] sm:$0xff] }
   0xf   :  { %1843 = vmatmul.msk.f32.gmra.mxu2 %vm206_vm0, %v91_v14  ;;  %v2195_v38 = vld [vmem:[%s4118_s0 + $0x80] sm:$0xff]  ;;  %v103_v43 = vld [vmem:[%s4119_s1 + $0xe8] sm:$0xff]  ;;  %4221 = vst [vmem:[#allocation5_spill] sm:$0xff] %v2229_v45  ;;  %v2234_v46 = vld [vmem:[%s4118_s0 + $0x90] sm:$0xff] }
  0x10   :  { %1851 = vmatmul.msk.f32.gmra.mxu3 %vm206_vm0, %v99_v15  ;;  %4219 = vst [vmem:[#allocation3_spill] sm:$0xff] %v2195_v38  ;;  %v2224_v44 = vld [vmem:[%s4118_s0 + $0xa0] sm:$0xff]  ;;  %v80_v47 = vld [vmem:[%s4119_s1 + $0x30] sm:$0xff]  ;;  %v2258_v51 = vld [vmem:[%s4118_s0 + $0xb8] sm:$0xff] }
  0x11   :  { %4220 = vst [vmem:[#allocation4_spill] sm:$0xff] %v2224_v44  ;;  %v88_v48 = vld [vmem:[%s4119_s1 + $0x70] sm:$0xff]  ;;  %v2268_v53 = vld [vmem:[%s4118_s0 + $0xa8] sm:$0xff]  ;;  %v81_v54 = vld [vmem:[%s4119_s1 + $0x38] sm:$0xff] }
  0x12   :  { %v96_v49 = vld [vmem:[%s4119_s1 + $0xb0] sm:$0xff]  ;;  %4222 = vst [vmem:[#allocation6_spill] sm:$0xff] %v2258_v51  ;;  %v89_v55 = vld [vmem:[%s4119_s1 + $0x78] sm:$0xff]  ;;  %v2297_v59 = vld [vmem:[%s4118_s0 + $0xc8] sm:$0xff] }
  0x13   :  { %v104_v50 = vld [vmem:[%s4119_s1 + $0xf0] sm:$0xff]  ;;  %4224 = vst [vmem:[#allocation8_spill] sm:$0xff] %v2268_v53  ;;  %v97_v56 = vld [vmem:[%s4119_s1 + $0xb8] sm:$0xff]  ;;  %v2302_v60 = vld [vmem:[%s4118_s0 + $0xc0] sm:$0xff] }
  0x14   :  { %449 = vperm.xlu2 %1868, %v2088_v16   ;;  %v2263_v52 = vld [vmem:[%s4118_s0 + $0xb0] sm:$0xff]  ;;  %v105_v57 = vld [vmem:[%s4119_s1 + $0xf8] sm:$0xff]  ;;  %4226 = vst [vmem:[#allocation10_spill] sm:$0xff] %v2297_v59  ;;  %v2310_v61 = vld [vmem:[%s4118_s0 + $0xe8] sm:$0xff] }
  0x15   :  { %445 = vperm.xlu1 %1867, %v2093_v17   ;;  %441 = vperm.xlu0 %1866, %v2098_v18   ;;  %4223 = vst [vmem:[#allocation7_spill] sm:$0xff] %v2263_v52  ;;  %v2292_v58 = vld [vmem:[%s4118_s0 + $0xd0] sm:$0xff]  ;;  %v2315_v62 = vld [vmem:[%s4118_s0 + $0xe0] sm:$0xff]  ;;  %v2320_v63 = vld [vmem:[%s4118_s0 + $0xd8] sm:$0xff] }
  0x16   :  { %1828 = vmatmul.msk.f32.gmra.mxu0 %vm206_vm0, %v76_v19  ;;  %1836 = vmatmul.msk.f32.gmra.mxu1 %vm206_vm0, %v84_v20  ;;  %4225 = vst [vmem:[#allocation9_spill] sm:$0xff] %v2292_v58  ;;  %v2328_v0 = vld [vmem:[%s4118_s0 + $0xf8] sm:$0xff]  ;;  %v2333_v1 = vld [vmem:[%s4118_s0 + $0xf0] sm:$0xff] }
  0x17   :  { %1844 = vmatmul.msk.f32.gmra.mxu2 %vm206_vm0, %v92_v21  ;;  %4227 = vst [vmem:[#allocation11_spill] sm:$0xff] %v2302_v60 }
  0x18   :  { %1852 = vmatmul.msk.f32.gmra.mxu3 %vm206_vm0, %v100_v22  ;;  %4228 = vst [vmem:[#allocation12_spill] sm:$0xff] %v2310_v61 }
  0x19   :  { %4229 = vst [vmem:[#allocation13_spill] sm:$0xff] %v2315_v62 }
  0x1a   :  { %4230 = vst [vmem:[#allocation14_spill] sm:$0xff] %v2320_v63 }
  0x1b   :  { %4231 = vst [vmem:[#allocation15_spill] sm:$0xff] %v2333_v1 }
  0x1c   :  { %461 = vperm.xlu2 %1868, %v2122_v23  }
  0x1d   :  { %457 = vperm.xlu1 %1867, %v2127_v24   ;;  %453 = vperm.xlu0 %1866, %v2132_v25  }
  0x1e   :  { %1829 = vmatmul.msk.f32.gmra.mxu0 %vm206_vm0, %v77_v26  ;;  %1837 = vmatmul.msk.f32.gmra.mxu1 %vm206_vm0, %v85_v27 }
  0x1f   :  { %1845 = vmatmul.msk.f32.gmra.mxu2 %vm206_vm0, %v93_v28 }
  0x20   :  { %1853 = vmatmul.msk.f32.gmra.mxu3 %vm206_vm0, %v101_v29 }
  0x24   :  { %473 = vperm.xlu2 %1868, %v2156_v30  }
  0x25   :  { %469 = vperm.xlu1 %1867, %v2161_v31   ;;  %465 = vperm.xlu0 %1866, %v2166_v32  }
  0x26   :  { %1830 = vmatmul.msk.f32.gmra.mxu0 %vm206_vm0, %v78_v33  ;;  %1838 = vmatmul.msk.f32.gmra.mxu1 %vm206_vm0, %v86_v34 }
  0x27   :  { %1846 = vmatmul.msk.f32.gmra.mxu2 %vm206_vm0, %v94_v35 }
  0x28   :  { %1854 = vmatmul.msk.f32.gmra.mxu3 %vm206_vm0, %v102_v36  ;;  %v2386_v36 = vld [vmem:[%s4120_s3 + $0x1] ss:$0 sm:$0xff] }
  0x2c   :  { %485 = vperm.xlu2 %1868, %v2190_v37  }
  0x2d   :  { %481 = vperm.xlu1 %1867, %v2195_v38   ;;  %477 = vperm.xlu0 %1866, %v2200_v39  }
  0x2e   :  { %1831 = vmatmul.msk.f32.gmra.mxu0 %vm206_vm0, %v79_v40  ;;  %1839 = vmatmul.msk.f32.gmra.mxu1 %vm206_vm0, %v87_v41 }
  0x2f   :  { %1847 = vmatmul.msk.f32.gmra.mxu2 %vm206_vm0, %v95_v42 }
  0x30   :  { %1855 = vmatmul.msk.f32.gmra.mxu3 %vm206_vm0, %v103_v43 }
  0x34   :  { %497 = vperm.xlu2 %1868, %v2224_v44  }
  0x35   :  { %493 = vperm.xlu1 %1867, %v2229_v45   ;;  %489 = vperm.xlu0 %1866, %v2234_v46  }
  0x36   :  { %1832 = vmatmul.msk.f32.gmra.mxu0 %vm206_vm0, %v80_v47  ;;  %1840 = vmatmul.msk.f32.gmra.mxu1 %vm206_vm0, %v88_v48 }
  0x37   :  { %1848 = vmatmul.msk.f32.gmra.mxu2 %vm206_vm0, %v96_v49 }
  0x38   :  { %1856 = vmatmul.msk.f32.gmra.mxu3 %vm206_vm0, %v104_v50 }
  0x3c   :  { %509 = vperm.xlu2 %1868, %v2258_v51  }
  0x3d   :  { %505 = vperm.xlu1 %1867, %v2263_v52   ;;  %501 = vperm.xlu0 %1866, %v2268_v53  }
  0x3e   :  { %1833 = vmatmul.msk.f32.gmra.mxu0 %vm206_vm0, %v81_v54  ;;  %1841 = vmatmul.msk.f32.gmra.mxu1 %vm206_vm0, %v89_v55 }
  0x3f   :  { %1849 = vmatmul.msk.f32.gmra.mxu2 %vm206_vm0, %v97_v56 }
  0x40   :  { %1857 = vmatmul.msk.f32.gmra.mxu3 %vm206_vm0, %v105_v57 }
  0x44   :  { %521 = vperm.xlu2 %1868, %v2292_v58  }
  0x45   :  { %517 = vperm.xlu1 %1867, %v2297_v59   ;;  %513 = vperm.xlu0 %1866, %v2302_v60  }
  0x4c   :  { %533 = vperm.xlu2 %1868, %v2310_v61  }
  0x4d   :  { %529 = vperm.xlu1 %1867, %v2315_v62   ;;  %525 = vperm.xlu0 %1866, %v2320_v63  }
  0x54   :  { %1869 = vset.pattern.permute.xlu2 %v1980_v5 }
  0x55   :  { %541 = vperm.xlu1 %1867, %v2328_v0   ;;  %537 = vperm.xlu0 %1866, %v2333_v1  }
  0x56   :  { %1058 = vperm.xlu2 %1869, %v2030_v4  }
  0x5d   :  { %1871 = vset.pattern.permute.xlu1 %v1980_v5  ;;  %1870 = vset.pattern.permute.xlu0 %v1980_v5 }
  0x5e   :  { %1064 = vperm.xlu1 %1871, %v2025_v3   ;;  %1067 = vperm.xlu2 %1869, %v2059_v10   ;;  %v2340_v6 = vpop.permute.xlu2 %433 }
  0x5f   :  { %1061 = vperm.xlu0 %1870, %v2064_v11  }
  0x66   :  { %1070 = vperm.xlu1 %1871, %v2020_v2   ;;  %1073 = vperm.xlu2 %1869, %v2054_v9   ;;  %v2345_v7 = vpop.permute.xlu2 %437 }
  0x67   :  { %1076 = vperm.xlu0 %1870, %v2098_v18  }
  0x6e   :  { %1079 = vperm.xlu1 %1871, %v2093_v17   ;;  %1082 = vperm.xlu2 %1869, %v2088_v16   ;;  %v450_v8 = vpop.permute.xlu2 %449 }
  0x6f   :  { %1085 = vperm.xlu0 %1870, %v2132_v25   ;;  %v553_v56 = vadd.f32 %v2386_v36, %v450_v8 }
  0x76   :  { %1088 = vperm.xlu1 %1871, %v2127_v24   ;;  %1091 = vperm.xlu2 %1869, %v2122_v23   ;;  %v2353_v12 = vpop.permute.xlu2 %461 }
  0x77   :  { %1094 = vperm.xlu0 %1870, %v2166_v32   ;;  %v2356_v13 = vpop.permute.xlu1 %425  ;;  %v418_v14 = vpop.permute.xlu0 %417 }
  0x78   :  { %v545_v41 = vadd.f32 %v2386_v36, %v418_v14 }
  0x7e   :  { %1097 = vperm.xlu1 %1871, %v2161_v31   ;;  %1100 = vperm.xlu2 %1869, %v2156_v30   ;;  %v2360_v15 = vpop.permute.xlu2 %473 }
  0x7f   :  { %1103 = vperm.xlu0 %1870, %v2200_v39   ;;  %v2363_v19 = vpop.permute.xlu1 %429  ;;  %v422_v20 = vpop.permute.xlu0 %421 }
  0x80   :  { %v546_v8 = vadd.f32 %v2386_v36, %v422_v20 }
  0x83   :  { %v320_v21 = vpop.f32.mrf.mxu0  ;;  %v344_v28 = vpop.f32.mrf.mxu1 }
  0x84   :  { %v577_v42 = vmul.f32 2.0, %v320_v21  ;;  %v585_v54 = vmul.f32 2.0, %v344_v28 }
  0x86   :  { %1106 = vperm.xlu1 %1871, %v2195_v38   ;;  %1109 = vperm.xlu2 %1869, %v2190_v37   ;;  %v2367_v22 = vpop.permute.xlu2 %485  ;;  %v609_v50 = vsub.f32 %v545_v41, %v577_v42  ;;  %v617_v21 = vsub.f32 %v553_v56, %v585_v54  ;;  %v548_v37 = vadd.f32 %v2386_v36, %v2363_v19  ;;  %v4237_v19 = vmov 0  }
  0x87   :  { %1112 = vperm.xlu0 %1870, %v2234_v46   ;;  %v2370_v26 = vpop.permute.xlu1 %445  ;;  %v2372_v27 = vpop.permute.xlu0 %441 }
  0x88   :  { %v2403_v57 = vmax.f32 %v609_v50, 0.0 }
  0x8a   :  { %4232 = vst [vmem:[#allocation16_spill] sm:$0xff] %v2403_v57  ;;  %1881 = vrsqrt.f32 %v2403_v57  ;;  %vm680_vm1 = vcmp.eq.f32.partialorder %v2403_v57, inf  ;;  %vm682_vm2 = vcmp.eq.f32.partialorder %v2403_v57, 0.0 }
  0x8b   :  { %v323_v35 = vpop.f32.mrf.mxu0  ;;  %v347_v48 = vpop.f32.mrf.mxu1 }
  0x8c   :  { %v2415_v41 = vpop.f32.mrf.mxu3  ;;  %v578_v50 = vmul.f32 2.0, %v323_v35 }
  0x8e   :  { %1115 = vperm.xlu1 %1871, %v2229_v45   ;;  %1118 = vperm.xlu2 %1869, %v2224_v44   ;;  %v2376_v29 = vpop.permute.xlu2 %497 }
  0x8f   :  { %1121 = vperm.xlu0 %1870, %v2268_v53   ;;  %v2379_v33 = vpop.permute.xlu1 %457  ;;  %v2381_v34 = vpop.permute.xlu0 %453 }
  0x93   :  { %v326_v49 = vpop.f32.mrf.mxu0  ;;  %v2412_v28 = vpop.f32.mrf.mxu1 }
  0x96   :  { %1124 = vperm.xlu1 %1871, %v2263_v52   ;;  %1127 = vperm.xlu2 %1869, %v2258_v51   ;;  %v2390_v40 = vpop.permute.xlu2 %509  ;;  %v2410_v51 = vpop.f32.mrf.mxu2 }
  0x97   :  { %1130 = vperm.xlu0 %1870, %v2302_v60   ;;  %v2394_v43 = vpop.permute.xlu1 %469  ;;  %v2396_v47 = vpop.permute.xlu0 %465 }
  0x9b   :  { %v329_v42 = vpop.f32.mrf.mxu0  ;;  %v353_v60 = vpop.f32.mrf.mxu1 }
  0x9c   :  { %v580_v53 = vmul.f32 2.0, %v329_v42  ;;  %v588_v38 = vmul.f32 2.0, %v353_v60 }
  0x9e   :  { %1133 = vperm.xlu1 %1871, %v2297_v59   ;;  %1136 = vperm.xlu2 %1869, %v2292_v58   ;;  %v2400_v55 = vpop.permute.xlu2 %521  ;;  %v2417_v58 = vmax.f32 %v617_v21, 0.0  ;;  %v610_v21 = vsub.f32 %v546_v8, %v578_v50  ;;  %v371_v52 = vpop.f32.mrf.mxu2 }
  0x9f   :  { %1139 = vperm.xlu0 %1870, %v2320_v63   ;;  %v2406_v5 = vpop.permute.xlu1 %481  ;;  %v2408_v14 = vpop.permute.xlu0 %477 }
  0xa0   :  { %v1882_v63 = vpop.eup %1881  ;;  %1883 = vrsqrt.f32 %v2417_v58  ;;  %v2431_v35 = vmax.f32 %v610_v21, 0.0  ;;  %vm776_vm3 = vcmp.eq.f32.partialorder %v2417_v58, inf  ;;  %vm778_vm4 = vcmp.eq.f32.partialorder %v2417_v58, 0.0 }
  0xa1   :  { %v674_v20 = vmul.f32 %v1882_v63, %v2403_v57 }
  0xa2   :  { %1885 = vrsqrt.f32 %v2431_v35  ;;  %vm692_vm5 = vcmp.eq.f32.partialorder %v2431_v35, inf  ;;  %vm694_vm6 = vcmp.eq.f32.partialorder %v2431_v35, 0.0 }
  0xa3   :  { %v2435_v44 = vpop.f32.mrf.mxu0  ;;  %v675_v21 = vmul.f32 %v1882_v63, %v674_v20 }
  0xa6   :  { %1142 = vperm.xlu1 %1871, %v2315_v62   ;;  %1145 = vperm.xlu2 %1869, %v2310_v61   ;;  %v2422_v59 = vpop.permute.xlu2 %533  ;;  %v2433_v62 = vpop.f32.mrf.mxu3  ;;  %v579_v61 = vmul.f32 2.0, %v326_v49  ;;  %v547_v49 = vadd.f32 %v2386_v36, %v2356_v13  ;;  %v554_v13 = vadd.f32 %v2386_v36, %v2381_v34 }
  0xa7   :  { %1148 = vperm.xlu0 %1870, %v2333_v1   ;;  %v2425_v54 = vpop.permute.xlu1 %493  ;;  %v2427_v56 = vpop.permute.xlu0 %489  ;;  %v4136_v1 = vmov 0  }
  0xa8   :  { %v2439_v45 = vpop.eup %1883  ;;  %v611_v42 = vsub.f32 %v547_v49, %v579_v61  ;;  %v2465_v61 = vpop.f32.mrf.mxu1 }
  0xaa   :  { %v2461_v20 = vmax.f32 %v611_v42, 0.0 }
  0xac   :  { %4236 = vst [vmem:[#allocation20_spill] sm:$0xff] %v2461_v20  ;;  %1887 = vrsqrt.f32 %v2461_v20  ;;  %vm704_vm7 = vcmp.eq.f32.partialorder %v2461_v20, inf  ;;  %vm706_vm9 = vcmp.eq.f32.partialorder %v2461_v20, 0.0 }
  0xae   :  { %1151 = vperm.xlu1 %1871, %v2328_v0   ;;  %1872 = vset.pattern.permute.xlu2 %v4136_v1 }
  0xaf   :  { %1873 = vset.pattern.permute.xlu0 %v4136_v1  ;;  %v2442_v8 = vpop.permute.xlu1 %505  ;;  %1187 = vperm.xlu2 %1872, %v2030_v4   ;;  %v2445_v50 = vpop.permute.xlu0 %501  ;;  %v770_v1 = vmul.f32 %v2439_v45, %v2417_v58  ;;  %v612_v4 = vsub.f32 %v548_v37, %v580_v53 }
  0xb0   :  { %4233 = vst [vmem:[#allocation17_spill] sm:$0xff] %v2442_v8  ;;  %1191 = vperm.xlu0 %1873, %v2064_v11   ;;  %v2450_v0 = vpop.permute.xlu2 %1058  ;;  %v676_v8 = vmul.f32 0.5, %v675_v21  ;;  %v556_v11 = vadd.f32 %v2386_v36, %v2353_v12  ;;  %v2477_v12 = vpop.eup %1885 }
  0xb1   :  { %4234 = vst [vmem:[#allocation18_spill] sm:$0xff] %v2445_v50  ;;  %v586_v50 = vmul.f32 2.0, %v347_v48  ;;  %v771_v49 = vmul.f32 %v2439_v45, %v770_v1  ;;  %v2469_v37 = vmax.f32 %v612_v4, 0.0  ;;  %v335_v48 = vpop.f32.mrf.mxu0  ;;  %v2482_v4 = vpop.f32.mrf.mxu3 }
  0xb2   :  { %4235 = vst [vmem:[#allocation19_spill] sm:$0xff] %v2450_v0  ;;  %v2463_v0 = vpop.f32.mrf.mxu2  ;;  %v620_v34 = vsub.f32 %v556_v11, %v588_v38  ;;  %v677_v42 = vsub.f32 1.5, %v676_v8  ;;  %v550_v8 = vadd.f32 %v2386_v36, %v2345_v7  ;;  %v562_v11 = vadd.f32 %v2386_v36, %v2367_v22  ;;  %v2520_v22 = vpop.eup %1887 }
  0xb3   :  { %v618_v1 = vsub.f32 %v554_v13, %v586_v50  ;;  %1889 = vrsqrt.f32 %v2469_v37  ;;  %v2498_v50 = vadd.f32 %v2386_v36, %v2360_v15  ;;  %vm716_vm8 = vcmp.eq.f32.partialorder %v2469_v37, inf }
  0xb4   :  { %v678_v38 = vmul.f32 %v1882_v63, %v677_v42  ;;  %v2506_v63 = vadd.f32 %v2386_v36, %v2370_v26  ;;  %v2537_v42 = vmul.f32 2.0, %v2415_v41  ;;  %v581_v41 = vmul.f32 2.0, %v2435_v44 }
  0xb5   :  { %v2500_v13 = vmax.f32 %v618_v1, 0.0  ;;  %v2564_v44 = vmul.f32 2.0, %v2433_v62  ;;  %vm718_vm10 = vcmp.eq.f32.partialorder %v2469_v37, 0.0 }
  0xb6   :  { %1874 = vset.pattern.permute.xlu1 %v4237_v19  ;;  %v772_v19 = vmul.f32 0.5, %v771_v49  ;;  %v594_v49 = vmul.f32 2.0, %v371_v52  ;;  %4242 = vst [vmem:[#allocation25_spill] sm:$0xff] %v2506_v63 }
  0xb7   :  { %1195 = vperm.xlu1 %1874, %v2025_v3   ;;  %v2472_v53 = vpop.permute.xlu1 %517  ;;  %1199 = vperm.xlu2 %1872, %v2059_v10   ;;  %v2475_v60 = vpop.permute.xlu0 %513  ;;  %v686_v3 = vmul.f32 %v2477_v12, %v2431_v35  ;;  %v2488_v10 = vmax.f32 %v620_v34, 0.0  ;;  %v582_v34 = vmul.f32 2.0, %v335_v48  ;;  %v2534_v48 = vmul.f32 2.0, %v2410_v51  ;;  %4246 = vst [vmem:[#allocation29_spill] sm:$0xff] %v2537_v42 }
  0xb8   :  { %4238 = vst [vmem:[#allocation21_spill] sm:$0xff] %v2472_v53  ;;  %1211 = vperm.xlu0 %1873, %v2098_v18   ;;  %v2480_v21 = vpop.permute.xlu2 %1067  ;;  %v2492_v18 = vadd.f32 %v2386_v36, %v2340_v6  ;;  %v2510_v6 = vadd.f32 %v2386_v36, %v2372_v27  ;;  %v626_v1 = vsub.f32 %v562_v11, %v594_v49 }
  0xb9   :  { %4239 = vst [vmem:[#allocation22_spill] sm:$0xff] %v2475_v60  ;;  %v687_v52 = vmul.f32 %v2477_v12, %v686_v3  ;;  %1891 = vrsqrt.f32 %v2488_v10  ;;  %v614_v3 = vsub.f32 %v550_v8, %v582_v34  ;;  %v555_v51 = vadd.f32 %v2386_v36, %v2379_v33 }
  0xba   :  { %4240 = vst [vmem:[#allocation23_spill] sm:$0xff] %v2480_v21  ;;  %v773_v21 = vsub.f32 1.5, %v772_v19  ;;  %v2522_v26 = vpop.f32.mrf.mxu2  ;;  %v2531_v19 = vpop.eup %1889  ;;  %1893 = vrsqrt.f32 %v2500_v13  ;;  %v2561_v33 = vadd.f32 %v2386_v36, %v2376_v29  ;;  %v613_v29 = vsub.f32 %v2492_v18, %v581_v41 }
  0xbb   :  { %4241 = vst [vmem:[#allocation24_spill] sm:$0xff] %v2488_v10  ;;  %v688_v42 = vmul.f32 0.5, %v687_v52  ;;  %v2568_v52 = vmax.f32 %v626_v1, 0.0  ;;  %v603_v18 = vmul.f32 2.0, %v2482_v4  ;;  %vm812_vm11 = vcmp.eq.f32.partialorder %v2488_v10, inf }
  0xbc   :  { %vm814_vm12 = vcmp.eq.f32.partialorder %v2488_v10, 0.0 }
  0xbd   :  { %4247 = vst [vmem:[#allocation30_spill] sm:$0xff] %v2568_v52  ;;  %v689_v1 = vsub.f32 1.5, %v688_v42 }
  0xbf   :  { %1203 = vperm.xlu1 %1874, %v2020_v2   ;;  %v2513_v7 = vpop.permute.xlu1 %529  ;;  %1207 = vperm.xlu2 %1872, %v2054_v9   ;;  %v2516_v15 = vpop.permute.xlu0 %525  ;;  %v679_v2 = vmul.f32 %v678_v38, %v2403_v57  ;;  %v683_v9 = vand.u32 2147483648, %v2403_v57 }
  0xc0   :  { %4243 = vst [vmem:[#allocation26_spill] sm:$0xff] %v2513_v7  ;;  %1223 = vperm.xlu0 %1873, %v2132_v25   ;;  %v2525_v27 = vpop.permute.xlu2 %1073  ;;  %v587_v25 = vmul.f32 2.0, %v2412_v28  ;;  %v2541_v38 = vpop.f32.mrf.mxu1  ;;  %v698_v28 = vmul.f32 %v2520_v22, %v2461_v20 }
  0xc1   :  { %4244 = vst [vmem:[#allocation27_spill] sm:$0xff] %v2516_v15  ;;  %v774_v15 = vmul.f32 %v2439_v45, %v773_v21  ;;  %v2547_v7 = vpop.f32.mrf.mxu3  ;;  %v681_v8 = vsel %vm680_vm1, %v2403_v57, %v679_v2  ;;  %v710_v45 = vmul.f32 %v2531_v19, %v2469_v37  ;;  %v779_v21 = vand.u32 2147483648, %v2417_v58  ;;  %v2566_v34 = vpop.eup %1891 }
  0xc2   :  { %4245 = vst [vmem:[#allocation28_spill] sm:$0xff] %v2525_v27  ;;  %v338_v27 = vpop.f32.mrf.mxu0  ;;  %v619_v11 = vsub.f32 %v555_v51, %v587_v25  ;;  %v2570_v2 = vmax.f32 %v614_v3, 0.0  ;;  %v2574_v63 = vpop.eup %1893  ;;  %v684_v25 = vsel %vm682_vm2, %v683_v9, %v681_v8  ;;  %v2588_v3 = vadd.f32 %v2386_v36, %v2390_v40 }
  0xc3   :  { %v583_v49 = vmul.f32 2.0, %v338_v27  ;;  %v775_v60 = vmul.f32 %v774_v15, %v2417_v58  ;;  %v699_v15 = vmul.f32 %v2520_v22, %v698_v28  ;;  %v711_v51 = vmul.f32 %v2531_v19, %v710_v45  ;;  %v380_v42 = vpop.f32.mrf.mxu2 }
  0xc4   :  { %v2597_v41 = vmax.f32 %v619_v11, 0.0  ;;  %v2601_v9 = vadd.f32 %v2386_v36, %v2394_v43  ;;  %v806_v4 = vmul.f32 %v2566_v34, %v2488_v10  ;;  %v1603_v28 = vsub.f32 10.0, %v684_v25 }
  0xc5   :  { %v615_v40 = vsub.f32 %v2510_v6, %v583_v49  ;;  %1895 = vrsqrt.f32 %v2570_v2  ;;  %v557_v43 = vadd.f32 %v2386_v36, %v2396_v47  ;;  %v2615_v6 = vmax.f32 %v613_v29, 0.0 }
  0xc6   :  { %4250 = vst [vmem:[#allocation33_spill] sm:$0xff] %v2597_v41  ;;  %v690_v8 = vmul.f32 %v2477_v12, %v689_v1  ;;  %v700_v45 = vmul.f32 0.5, %v699_v15  ;;  %v561_v49 = vadd.f32 %v2386_v36, %v2406_v5  ;;  %v712_v53 = vmul.f32 0.5, %v711_v51 }
  0xc7   :  { %1215 = vperm.xlu1 %1874, %v2093_v17   ;;  %v2578_v62 = vpop.permute.xlu1 %541  ;;  %1219 = vperm.xlu2 %1872, %v2088_v16   ;;  %v2581_v27 = vpop.permute.xlu0 %537  ;;  %v571_v17 = vadd.f32 %v2386_v36, %v2400_v55  ;;  %v782_v55 = vmul.f32 %v2574_v63, %v2500_v13  ;;  %v807_v12 = vmul.f32 %v2566_v34, %v806_v4  ;;  %v589_v29 = vmul.f32 2.0, %v2465_v61 }
  0xc8   :  { %4248 = vst [vmem:[#allocation31_spill] sm:$0xff] %v2581_v27  ;;  %1235 = vperm.xlu0 %1873, %v2166_v32   ;;  %v2594_v16 = vpop.permute.xlu2 %1082  ;;  %v777_v32 = vsel %vm776_vm3, %v2417_v58, %v775_v60  ;;  %v362_v25 = vpop.f32.mrf.mxu1  ;;  %v707_v60 = vand.u32 2147483648, %v2461_v20  ;;  %v2626_v27 = vmax.f32 %v615_v40, 0.0  ;;  %v2634_v5 = vadd.f32 %v2386_v36, %v2408_v14 }
  0xc9   :  { %4249 = vst [vmem:[#allocation32_spill] sm:$0xff] %v2594_v16  ;;  %v635_v11 = vsub.f32 %v571_v17, %v603_v18  ;;  %v2622_v16 = vmul.f32 2.0, %v2463_v0  ;;  %v2624_v57 = vpop.f32.mrf.mxu3  ;;  %v780_v47 = vsel %vm778_vm4, %v779_v21, %v777_v32  ;;  %v2637_v1 = vmax.f32 %v1603_v28, 0.0 }
  0xca   :  { %v783_v0 = vmul.f32 %v2574_v63, %v782_v55  ;;  %v591_v15 = vmul.f32 2.0, %v362_v25  ;;  %v691_v21 = vmul.f32 %v690_v8, %v2431_v35  ;;  %v701_v18 = vsub.f32 1.5, %v700_v45 }
  0xcb   :  { %1897 = vrsqrt.f32 %v2615_v6  ;;  %v2644_v17 = vpop.eup %1895  ;;  %v2646_v14 = vmax.f32 %v635_v11, 0.0  ;;  %v625_v61 = vsub.f32 %v561_v49, %v2534_v48  ;;  %v1611_v4 = vsub.f32 10.0, %v780_v47  ;;  %v383_v11 = vpop.f32.mrf.mxu2 }
  0xcc   :  { %v2656_v28 = vmul.f32 2.0, %v2547_v7  ;;  %v808_v55 = vmul.f32 0.5, %v807_v12  ;;  %1899 = vrsqrt.f32 %v2626_v27  ;;  %v621_v8 = vsub.f32 %v557_v43, %v589_v29  ;;  %v341_v49 = vpop.f32.mrf.mxu0 }
  0xcd   :  { %v563_v48 = vadd.f32 %v2386_v36, %v2427_v56  ;;  %v734_v7 = vmul.f32 %v2644_v17, %v2570_v2  ;;  %v693_v43 = vsel %vm692_vm5, %v2431_v35, %v691_v21  ;;  %v2675_v45 = vmax.f32 %v625_v61, 0.0 }
  0xce   :  { %v2679_v56 = vadd.f32 %v2386_v36, %v2422_v59  ;;  %v2682_v25 = vmax.f32 %v1611_v4, 0.0  ;;  %v597_v12 = vmul.f32 2.0, %v380_v42  ;;  %v590_v29 = vmul.f32 2.0, %v2541_v38 }
  0xcf   :  { %1227 = vperm.xlu1 %1874, %v2127_v24   ;;  %1231 = vperm.xlu2 %1872, %v2122_v23   ;;  %v713_v24 = vsub.f32 1.5, %v712_v53  ;;  %v596_v23 = vmul.f32 2.0, %v2522_v26  ;;  %v623_v26 = vsub.f32 %v2498_v50, %v591_v15  ;;  %v2689_v21 = vmax.f32 %v621_v8, 0.0  ;;  %v4259_v15 = vld [vmem:[#allocation25_spill] sm:$0xff] }
  0xd0   :  { %1247 = vperm.xlu0 %1873, %v2200_v39   ;;  %v2650_v51 = vpop.permute.xlu1 %1064  ;;  %v2652_v40 = vpop.permute.xlu2 %1091  ;;  %v564_v39 = vadd.f32 %v2386_v36, %v2425_v54  ;;  %v702_v54 = vmul.f32 %v2520_v22, %v701_v18  ;;  %v809_v22 = vsub.f32 1.5, %v808_v55  ;;  %v627_v18 = vsub.f32 %v563_v48, %v2622_v16 }
  0xd1   :  { %4251 = vst [vmem:[#allocation34_spill] sm:$0xff] %v2652_v40  ;;  %v2658_v32 = vpop.permute.xlu0 %1061  ;;  %v714_v50 = vmul.f32 %v2531_v19, %v713_v24  ;;  %v2684_v47 = vpop.eup %1897  ;;  %v4254_v19 = vand.u32 2147483648, %v2431_v35  ;;  %v2699_v24 = vmax.f32 %v623_v26, 0.0  ;;  %v584_v4 = vmul.f32 2.0, %v341_v49 }
  0xd2   :  { %4252 = vst [vmem:[#allocation35_spill] sm:$0xff] %v2658_v32  ;;  %v628_v59 = vsub.f32 %v564_v39, %v596_v23  ;;  %v2697_v42 = vpop.eup %1899  ;;  %v407_v38 = vpop.f32.mrf.mxu3  ;;  %v735_v23 = vmul.f32 %v2644_v17, %v734_v7  ;;  %v703_v16 = vmul.f32 %v702_v54, %v2461_v20  ;;  %v2706_v55 = vmul.f32 2.0, %v2624_v57 }
  0xd3   :  { %4253 = vst [vmem:[#allocation36_spill] sm:$0xff] %v2689_v21  ;;  %v696_v61 = vsel %vm694_vm6, %v4254_v19, %v693_v43  ;;  %v715_v48 = vmul.f32 %v714_v50, %v2469_v37  ;;  %v629_v26 = vsub.f32 %v2561_v33, %v597_v12  ;;  %v622_v57 = vsub.f32 %v2601_v9, %v590_v29 }
  0xd4   :  { %v810_v43 = vmul.f32 %v2566_v34, %v809_v22  ;;  %v2724_v54 = vmax.f32 %v628_v59, 0.0  ;;  %v2726_v49 = vmax.f32 %v627_v18, 0.0  ;;  %v598_v50 = vmul.f32 2.0, %v383_v11  ;;  %v4260_v34 = vld [vmem:[#allocation18_spill] sm:$0xff] }
  0xd5   :  { %v746_v19 = vmul.f32 %v2697_v42, %v2626_v27  ;;  %v736_v53 = vmul.f32 0.5, %v735_v23  ;;  %v705_v33 = vsel %vm704_vm7, %v2461_v20, %v703_v16  ;;  %1901 = vrsqrt.f32 %v2699_v24 }
  0xd6   :  { %4258 = vst [vmem:[#allocation40_spill] sm:$0xff] %v2726_v49  ;;  %v566_v9 = vadd.f32 %v2386_v36, %v4260_v34  ;;  %v606_v12 = vmul.f32 2.0, %v407_v38  ;;  %v717_v11 = vsel %vm716_vm8, %v2469_v37, %v715_v48  ;;  %v2742_v22 = vmax.f32 %v629_v26, 0.0  ;;  %v386_v38 = vpop.f32.mrf.mxu2  ;;  %v4266_v34 = vld [vmem:[#allocation3_spill] sm:$0xff] }
  0xd7   :  { %1239 = vperm.xlu1 %1874, %v2161_v31   ;;  %1243 = vperm.xlu2 %1872, %v2156_v30   ;;  %v722_v30 = vmul.f32 %v2684_v47, %v2615_v6  ;;  %v2717_v31 = vmul.f32 0.5, %v783_v0  ;;  %v616_v0 = vsub.f32 %v4259_v15, %v584_v4  ;;  %v2744_v15 = vmax.f32 %v622_v57, 0.0 }
  0xd8   :  { %1259 = vperm.xlu0 %1873, %v2234_v46   ;;  %v2709_v8 = vpop.permute.xlu1 %1070  ;;  %v2711_v39 = vpop.permute.xlu2 %1100  ;;  %v1604_v46 = vsub.f32 10.0, %v696_v61  ;;  %v811_v18 = vmul.f32 %v810_v43, %v2488_v10  ;;  %v4263_v61 = vld [vmem:[#allocation17_spill] sm:$0xff]  ;;  %v630_v23 = vsub.f32 %v566_v9, %v598_v50  ;;  %v708_v16 = vsel %vm706_vm9, %v707_v60, %v705_v33 }
  0xd9   :  { %4255 = vst [vmem:[#allocation37_spill] sm:$0xff] %v2709_v8  ;;  %v2721_v7 = vpop.permute.xlu0 %1076  ;;  %v723_v29 = vmul.f32 %v2684_v47, %v722_v30  ;;  %v2751_v4 = vadd.f32 %v2386_v36, %v4263_v61  ;;  %v747_v48 = vmul.f32 %v2697_v42, %v746_v19  ;;  %v4264_v30 = vld [vmem:[#allocation21_spill] sm:$0xff]  ;;  %v2760_v57 = vmax.f32 %v616_v0, 0.0  ;;  %v4267_v61 = vld [vmem:[#allocation2_spill] sm:$0xff] }
  0xda   :  { %4256 = vst [vmem:[#allocation38_spill] sm:$0xff] %v2711_v39  ;;  %v2746_v59 = vmax.f32 %v1604_v46, 0.0  ;;  %v570_v26 = vadd.f32 %v2386_v36, %v4264_v30  ;;  %v365_v46 = vpop.f32.mrf.mxu1  ;;  %v410_v43 = vpop.f32.mrf.mxu3  ;;  %v4268_v50 = vand.u32 2147483648, %v2469_v37  ;;  %v737_v39 = vsub.f32 1.5, %v736_v53  ;;  %v4269_v19 = vld [vmem:[#allocation22_spill] sm:$0xff]  ;;  %v4270_v30 = vld [vmem:[#allocation8_spill] sm:$0xff] }
  0xdb   :  { %4257 = vst [vmem:[#allocation39_spill] sm:$0xff] %v2721_v7  ;;  %v638_v60 = vsub.f32 %v2679_v56, %v606_v12  ;;  %v569_v33 = vadd.f32 %v2386_v36, %v4269_v19  ;;  %1903 = vrsqrt.f32 %v2568_v52  ;;  %v599_v20 = vmul.f32 2.0, %v386_v38  ;;  %v4274_v38 = vld [vmem:[#allocation29_spill] sm:$0xff] }
  0xdc   :  { %4261 = vst [vmem:[#allocation25_spill] sm:$0xff] %v2744_v15  ;;  %v720_v9 = vsel %vm718_vm10, %v4268_v50, %v717_v11  ;;  %v1605_v53 = vsub.f32 10.0, %v708_v16  ;;  %v813_v56 = vsel %vm812_vm11, %v2488_v10, %v811_v18  ;;  %1905 = vrsqrt.f32 %v2689_v21 }
  0xdd   :  { %4262 = vst [vmem:[#allocation18_spill] sm:$0xff] %v2746_v59  ;;  %v592_v12 = vmul.f32 2.0, %v365_v46  ;;  %v1606_v11 = vsub.f32 10.0, %v720_v9  ;;  %v748_v50 = vmul.f32 0.5, %v747_v48  ;;  %1907 = vrsqrt.f32 %v2597_v41 }
  0xde   :  { %4265 = vst [vmem:[#allocation17_spill] sm:$0xff] %v2760_v57  ;;  %v738_v19 = vmul.f32 %v2644_v17, %v737_v39  ;;  %vm740_vm13 = vcmp.eq.f32.partialorder %v2570_v2, inf  ;;  %1909 = vrsqrt.f32 %v2760_v57  ;;  %v633_v16 = vsub.f32 %v569_v33, %v4274_v38 }
  0xdf   :  { %1251 = vperm.xlu1 %1874, %v4266_v34   ;;  %1255 = vperm.xlu2 %1872, %v4267_v61   ;;  %v724_v34 = vmul.f32 0.5, %v723_v29  ;;  %v2777_v61 = vpop.eup %1901  ;;  %v634_v29 = vsub.f32 %v570_v26, %v2564_v44  ;;  %v2797_v9 = vmax.f32 %v630_v23, 0.0  ;;  %v2799_v44 = vmax.f32 %v638_v60, 0.0  ;;  %v4277_v60 = vld [vmem:[#allocation5_spill] sm:$0xff] }
  0xe0   :  { %1271 = vperm.xlu0 %1873, %v4270_v30   ;;  %v2772_v0 = vpop.permute.xlu1 %1079  ;;  %v2774_v8 = vpop.permute.xlu2 %1109  ;;  %v4275_v30 = vand.u32 2147483648, %v2488_v10  ;;  %v842_v48 = vmul.f32 %v2777_v61, %v2699_v24  ;;  %v631_v17 = vsub.f32 %v2751_v4, %v599_v20  ;;  %vm742_vm14 = vcmp.eq.f32.partialorder %v2570_v2, 0.0  ;;  %v4278_v20 = vld [vmem:[#allocation4_spill] sm:$0xff] }
  0xe1   :  { %4271 = vst [vmem:[#allocation21_spill] sm:$0xff] %v2772_v0  ;;  %v2779_v7 = vpop.permute.xlu0 %1085  ;;  %v725_v46 = vsub.f32 1.5, %v724_v34  ;;  %v743_v39 = vand.u32 2147483648, %v2570_v2  ;;  %v2804_v26 = vpop.eup %1903  ;;  %v624_v33 = vsub.f32 %v2634_v5, %v592_v12  ;;  %v2807_v38 = vmax.f32 %v1606_v11, 0.0 }
  0xe2   :  { %4272 = vst [vmem:[#allocation3_spill] sm:$0xff] %v2774_v8  ;;  %v816_v18 = vsel %vm814_vm12, %v4275_v30, %v813_v56  ;;  %v2809_v34 = vmax.f32 %v1605_v53, 0.0  ;;  %v749_v56 = vsub.f32 1.5, %v748_v50  ;;  %v2811_v30 = vpop.eup %1905  ;;  %v2813_v23 = vmul.f32 2.0, %v410_v43  ;;  %v4280_v50 = vld [vmem:[#allocation11_spill] sm:$0xff] }
  0xe3   :  { %4273 = vst [vmem:[#allocation2_spill] sm:$0xff] %v2779_v7  ;;  %v739_v4 = vmul.f32 %v738_v19, %v2570_v2  ;;  %v1614_v8 = vsub.f32 10.0, %v816_v18  ;;  %vm728_vm15 = vcmp.eq.f32.partialorder %v2615_v6, inf  ;;  %v785_v5 = vsub.f32 1.5, %v2717_v31  ;;  %v2820_v12 = vpop.eup %1907  ;;  %v4283_v31 = vld [vmem:[#allocation26_spill] sm:$0xff]  ;;  %v389_v7 = vpop.f32.mrf.mxu2 }
  0xe4   :  { %4276 = vst [vmem:[#allocation22_spill] sm:$0xff] %v2809_v34  ;;  %v2822_v53 = vmax.f32 %v634_v29, 0.0  ;;  %v2824_v11 = vmax.f32 %v633_v16, 0.0  ;;  %v843_v19 = vmul.f32 %v2777_v61, %v842_v48  ;;  %v2833_v18 = vpop.eup %1909  ;;  %v2835_v0 = vmax.f32 %v631_v17, 0.0 }
  0xe5   :  { %v573_v29 = vadd.f32 %v2386_v36, %v4283_v31  ;;  %vm752_vm0 = vcmp.eq.f32.partialorder %v2626_v27, inf  ;;  %v750_v48 = vmul.f32 %v2697_v42, %v749_v56  ;;  %vm730_vm1 = vcmp.eq.f32.partialorder %v2615_v6, 0.0 }
  0xe6   :  { %4279 = vst [vmem:[#allocation8_spill] sm:$0xff] %v2822_v53  ;;  %v4284_v53 = vld [vmem:[#allocation27_spill] sm:$0xff]  ;;  %vm788_vm2 = vcmp.eq.f32.partialorder %v2500_v13, inf  ;;  %v878_v17 = vmul.f32 %v2804_v26, %v2568_v52  ;;  %v741_v31 = vsel %vm740_vm13, %v2570_v2, %v739_v4  ;;  %v794_v42 = vmul.f32 %v2820_v12, %v2597_v41 }
  0xe7   :  { %1263 = vperm.xlu1 %1874, %v4277_v60   ;;  %1267 = vperm.xlu2 %1872, %v4278_v20   ;;  %v726_v20 = vmul.f32 %v2684_v47, %v725_v46  ;;  %v572_v16 = vadd.f32 %v2386_v36, %v4284_v53  ;;  %v2845_v47 = vmax.f32 %v624_v33, 0.0  ;;  %v413_v46 = vpop.f32.mrf.mxu3  ;;  %v818_v53 = vmul.f32 %v2811_v30, %v2689_v21 }
  0xe8   :  { %1283 = vperm.xlu0 %1873, %v4280_v50   ;;  %v2827_v43 = vpop.permute.xlu1 %1088  ;;  %v2829_v60 = vpop.permute.xlu2 %1118  ;;  %v786_v33 = vmul.f32 %v2574_v63, %v785_v5  ;;  %v600_v56 = vmul.f32 2.0, %v389_v7  ;;  %vm754_vm3 = vcmp.eq.f32.partialorder %v2626_v27, 0.0  ;;  %v844_v10 = vmul.f32 0.5, %v843_v19 }
  0xe9   :  { %4281 = vst [vmem:[#allocation29_spill] sm:$0xff] %v2827_v43  ;;  %v2841_v50 = vpop.permute.xlu0 %1094  ;;  %v2857_v43 = vmax.f32 %v1614_v8, 0.0  ;;  %v758_v34 = vmul.f32 %v2833_v18, %v2760_v57  ;;  %v637_v59 = vsub.f32 %v573_v29, %v2706_v55  ;;  %v636_v4 = vsub.f32 %v572_v16, %v2656_v28  ;;  %v4288_v55 = vld [vmem:[#allocation6_spill] sm:$0xff] }
  0xea   :  { %4282 = vst [vmem:[#allocation5_spill] sm:$0xff] %v2829_v60  ;;  %v755_v60 = vand.u32 2147483648, %v2626_v27  ;;  %v608_v8 = vmul.f32 2.0, %v413_v46  ;;  %v576_v63 = vadd.f32 %v2386_v36, %v2578_v62  ;;  %vm790_vm4 = vcmp.eq.f32.partialorder %v2500_v13, 0.0  ;;  %v4289_v16 = vld [vmem:[#allocation14_spill] sm:$0xff] }
  0xeb   :  { %4285 = vst [vmem:[#allocation4_spill] sm:$0xff] %v2841_v50  ;;  %v727_v50 = vmul.f32 %v726_v20, %v2615_v6  ;;  %v744_v7 = vsel %vm742_vm14, %v743_v39, %v741_v31  ;;  %v751_v5 = vmul.f32 %v750_v48, %v2626_v27  ;;  %v879_v20 = vmul.f32 %v2804_v26, %v878_v17 }
  0xec   :  { %4286 = vst [vmem:[#allocation11_spill] sm:$0xff] %v2857_v43  ;;  %v819_v19 = vmul.f32 %v2811_v30, %v818_v53  ;;  %v4287_v43 = vld [vmem:[#allocation7_spill] sm:$0xff]  ;;  %v731_v28 = vand.u32 2147483648, %v2615_v6  ;;  %v787_v29 = vmul.f32 %v786_v33, %v2500_v13  ;;  %v795_v62 = vmul.f32 %v2820_v12, %v794_v42 }
  0xed   :  { %1911 = vrsqrt.f32 %v2742_v22  ;;  %v632_v39 = vsub.f32 %v2588_v3, %v600_v56  ;;  %v845_v17 = vsub.f32 1.5, %v844_v10  ;;  %v759_v53 = vmul.f32 %v2833_v18, %v758_v34  ;;  %v4293_v42 = vld [vmem:[#allocation31_spill] sm:$0xff] }
  0xee   :  { %v2892_v31 = vmax.f32 %v637_v59, 0.0  ;;  %v640_v33 = vsub.f32 %v576_v63, %v608_v8  ;;  %v1608_v56 = vsub.f32 10.0, %v744_v7  ;;  %1913 = vrsqrt.f32 %v2744_v15 }
  0xef   :  { %1275 = vperm.xlu1 %1874, %v4287_v43   ;;  %1279 = vperm.xlu2 %1872, %v4288_v55   ;;  %v729_v43 = vsel %vm728_vm15, %v2615_v6, %v727_v50  ;;  %v575_v55 = vadd.f32 %v2386_v36, %v4293_v42  ;;  %v789_v59 = vsel %vm788_vm2, %v2500_v13, %v787_v29  ;;  %v796_v34 = vmul.f32 0.5, %v795_v62  ;;  %v4298_v42 = vld [vmem:[#allocation15_spill] sm:$0xff] }
  0xf0   :  { %1295 = vperm.xlu0 %1873, %v4289_v16   ;;  %v2884_v46 = vpop.permute.xlu1 %1097  ;;  %v2886_v48 = vpop.permute.xlu2 %1127  ;;  %4292 = vst [vmem:[#allocation7_spill] sm:$0xff] %v2892_v31  ;;  %v753_v16 = vsel %vm752_vm0, %v2626_v27, %v751_v5  ;;  %v732_v10 = vsel %vm730_vm1, %v731_v28, %v729_v43  ;;  %1915 = vrsqrt.f32 %v2845_v47  ;;  %v2908_v36 = vmax.f32 %v632_v39, 0.0  ;;  %v4296_v43 = vld [vmem:[#allocation10_spill] sm:$0xff] }
  0xf1   :  { %4290 = vst [vmem:[#allocation26_spill] sm:$0xff] %v2884_v46  ;;  %v2896_v3 = vpop.permute.xlu0 %1103  ;;  %v820_v46 = vmul.f32 0.5, %v819_v19  ;;  %v846_v50 = vmul.f32 %v2777_v61, %v845_v17  ;;  %v791_v8 = vand.u32 2147483648, %v2500_v13  ;;  %v760_v63 = vmul.f32 0.5, %v759_v53 }
  0xf2   :  { %4291 = vst [vmem:[#allocation27_spill] sm:$0xff] %v2886_v48  ;;  %v880_v48 = vmul.f32 0.5, %v879_v20  ;;  %v2914_v5 = vmax.f32 %v636_v4, 0.0  ;;  %v639_v20 = vsub.f32 %v575_v55, %v2813_v23  ;;  %v756_v19 = vsel %vm754_vm3, %v755_v60, %v753_v16  ;;  %v4297_v4 = vld [vmem:[#allocation9_spill] sm:$0xff] }
  0xf3   :  { %4294 = vst [vmem:[#allocation6_spill] sm:$0xff] %v2896_v3  ;;  %v2912_v7 = vpop.eup %1911  ;;  %vm848_vm5 = vcmp.eq.f32.partialorder %v2699_v24, inf  ;;  %v1607_v28 = vsub.f32 10.0, %v732_v10  ;;  %vm850_vm6 = vcmp.eq.f32.partialorder %v2699_v24, 0.0  ;;  %v792_v61 = vsel %vm790_vm4, %v791_v8, %v789_v59 }
  0xf4   :  { %v881_v29 = vsub.f32 1.5, %v880_v48  ;;  %v821_v62 = vsub.f32 1.5, %v820_v46  ;;  %v2923_v39 = vmax.f32 %v640_v33, 0.0  ;;  %v2927_v23 = vmax.f32 %v1608_v56, 0.0  ;;  %v2930_v53 = vpop.eup %1913 }
  0xf5   :  { %v851_v60 = vand.u32 2147483648, %v2699_v24  ;;  %v797_v17 = vsub.f32 1.5, %v796_v34  ;;  %v847_v46 = vmul.f32 %v846_v50, %v2699_v24  ;;  %v761_v48 = vsub.f32 1.5, %v760_v63 }
  0xf6   :  { %4295 = vst [vmem:[#allocation14_spill] sm:$0xff] %v2923_v39  ;;  %v914_v33 = vmul.f32 %v2912_v7, %v2742_v22  ;;  %1917 = vrsqrt.f32 %v2908_v36  ;;  %v2941_v56 = vpop.eup %1915  ;;  %v2943_v10 = vmax.f32 %v639_v20, 0.0  ;;  %v1609_v34 = vsub.f32 10.0, %v756_v19  ;;  %v1945_v20 = vld [vmem:[%s4118_s0 + $0x8] sm:$0xff] }
  0xf7   :  { %1287 = vperm.xlu1 %1874, %v4296_v43   ;;  %1291 = vperm.xlu2 %1872, %v4297_v4   ;;  %v1612_v8 = vsub.f32 10.0, %v792_v61  ;;  %vm884_vm7 = vcmp.eq.f32.partialorder %v2568_v52, inf  ;;  %v2949_v4 = vmax.f32 %v1607_v28, 0.0  ;;  %v882_v50 = vmul.f32 %v2804_v26, %v881_v29  ;;  %v4306_v43 = vld [vmem:[#allocation12_spill] sm:$0xff] }
  0xf8   :  { %1307 = vperm.xlu0 %1873, %v4298_v42   ;;  %v2933_v55 = vpop.permute.xlu1 %1106  ;;  %v2935_v16 = vpop.permute.xlu2 %1136  ;;  %4301 = vst [vmem:[#allocation9_spill] sm:$0xff] %v2943_v10  ;;  %v822_v63 = vmul.f32 %v2811_v30, %v821_v62  ;;  %1919 = vrsqrt.f32 %v2726_v49  ;;  %vm139_vm8 = vcmp.gt.f32.partialorder %v1945_v20, 0.0  ;;  %vm824_vm9 = vcmp.eq.f32.partialorder %v2689_v21, inf }
  0xf9   :  { %4299 = vst [vmem:[#allocation31_spill] sm:$0xff] %v2933_v55  ;;  %v2945_v59 = vpop.permute.xlu0 %1112  ;;  %v798_v19 = vmul.f32 %v2820_v12, %v797_v17  ;;  %v830_v61 = vmul.f32 %v2930_v53, %v2744_v15  ;;  %v849_v26 = vsel %vm848_vm5, %v2699_v24, %v847_v46  ;;  %v762_v30 = vmul.f32 %v2833_v18, %v761_v48 }
  0xfa   :  { %4300 = vst [vmem:[#allocation10_spill] sm:$0xff] %v2935_v16  ;;  %vm886_vm10 = vcmp.eq.f32.partialorder %v2568_v52, 0.0  ;;  %v915_v28 = vmul.f32 %v2912_v7, %v914_v33  ;;  %v854_v29 = vmul.f32 %v2941_v56, %v2845_v47  ;;  %v2969_v62 = vmax.f32 %v1609_v34, 0.0  ;;  %v4305_v33 = vld [vmem:[#allocation13_spill] sm:$0xff] }
  0xfb   :  { %4302 = vst [vmem:[#allocation15_spill] sm:$0xff] %v2945_v59  ;;  %vm826_vm11 = vcmp.eq.f32.partialorder %v2689_v21, 0.0  ;;  %v827_v12 = vand.u32 2147483648, %v2689_v21  ;;  %v4303_v42 = vmov 0   ;;  %v2976_v46 = vmax.f32 %v1612_v8, 0.0 }
  0xfc   :  { %v2973_v17 = vpop.eup %1917  ;;  %v1348_v20 = vsel %vm139_vm8, 1, %v4303_v42  ;;  %v883_v18 = vmul.f32 %v882_v50, %v2568_v52  ;;  %v823_v48 = vmul.f32 %v822_v63, %v2689_v21  ;;  %v852_v34 = vsel %vm850_vm6, %v851_v60, %v849_v26 }
  0xfd   :  { %4304 = vst [vmem:[#allocation41_spill] sm:$0xff] %v2976_v46  ;;  %v799_v39 = vmul.f32 %v798_v19, %v2597_v41  ;;  %vm800_vm12 = vcmp.eq.f32.partialorder %v2597_v41, inf  ;;  %v831_v16 = vmul.f32 %v2930_v53, %v830_v61  ;;  %v4161_v8 = vmov 1   ;;  %v3000_v61 = vld [vmem:[%s4121_s4] ss:$0 sm:$0xff] }
  0xfe   :  { %v2987_v55 = vpop.eup %1919  ;;  %vm802_vm13 = vcmp.eq.f32.partialorder %v2597_v41, 0.0  ;;  %v916_v60 = vmul.f32 0.5, %v915_v28  ;;  %v855_v19 = vmul.f32 %v2941_v56, %v854_v29  ;;  %vm764_vm14 = vcmp.eq.f32.partialorder %v2760_v57, inf  ;;  %v1946_v28 = vld [vmem:[%s4118_s0] sm:$0xff] }
  0xff   :  { %1299 = vperm.xlu1 %1874, %v4305_v33   ;;  %1303 = vperm.xlu2 %1872, %v4306_v43   ;;  %v763_v43 = vmul.f32 %v762_v30, %v2760_v57  ;;  %vm766_vm15 = vcmp.eq.f32.partialorder %v2760_v57, 0.0  ;;  %v803_v33 = vand.u32 2147483648, %v2597_v41  ;;  %v950_v30 = vmul.f32 %v2973_v17, %v2908_v36 }
 0x100   :  { %1876 = vset.pattern.permute.xlu0 %v4161_v8  ;;  %v2990_v50 = vpop.permute.xlu1 %1115  ;;  %v2992_v63 = vpop.permute.xlu2 %1145  ;;  %vm138_vm0 = vcmp.gt.f32.partialorder %v1946_v28, 0.0  ;;  %v1617_v29 = vsub.f32 10.0, %v852_v34  ;;  %v825_v8 = vsel %vm824_vm9, %v2689_v21, %v823_v48  ;;  %v890_v34 = vmul.f32 %v2987_v55, %v2726_v49  ;;  %v4310_v48 = vld [vmem:[#allocation19_spill] sm:$0xff] }
 0x101   :  { %4307 = vst [vmem:[#allocation13_spill] sm:$0xff] %v2990_v50  ;;  %1383 = vperm.xlu0 %1876, %v1348_v20   ;;  %v3002_v26 = vpop.permute.xlu0 %1121  ;;  %v885_v20 = vsel %vm884_vm7, %v2568_v52, %v883_v18  ;;  %v801_v50 = vsel %vm800_vm12, %v2597_v41, %v799_v39  ;;  %v765_v28 = vsel %vm764_vm14, %v2760_v57, %v763_v43  ;;  %v917_v18 = vsub.f32 1.5, %v916_v60  ;;  %v3041_v60 = vld [vmem:[%s4120_s3] ss:$0 sm:$0xff] }
 0x102   :  { %4308 = vst [vmem:[#allocation12_spill] sm:$0xff] %v2992_v63  ;;  %v1947_v63 = vld [vmem:[%s4118_s0 + $0x30] sm:$0xff]  ;;  %v856_v31 = vmul.f32 0.5, %v855_v19  ;;  %1921 = vrsqrt.f32 %v2675_v45  ;;  %vm1154_vm2 = vcmp.eq.s32.totalorder %v4310_v48, %v3000_v61  ;;  %v1347_v59 = vsel %vm138_vm0, 1, %v4303_v42 }
 0x103   :  { %4309 = vst [vmem:[#allocation42_spill] sm:$0xff] %v3002_v26  ;;  %vm144_vm1 = vcmp.gt.f32.partialorder %v1947_v63, 0.0  ;;  %v832_v26 = vmul.f32 0.5, %v831_v16  ;;  %v767_v63 = vand.u32 2147483648, %v2760_v57  ;;  %v4311_v3 = vand.u32 2147483648, %v2568_v52 }
 0x104   :  { %v951_v16 = vmul.f32 %v2973_v17, %v950_v30  ;;  %v1353_v43 = vsel %vm144_vm1, 1, %v4303_v42  ;;  %v828_v19 = vsel %vm826_vm11, %v827_v12, %v825_v8  ;;  %v3047_v10 = vsel %vm802_vm13, %v803_v33, %v801_v50 }
 0x105   :  { %v888_v39 = vsel %vm886_vm10, %v4311_v3, %v885_v20  ;;  %v3053_v3 = vld [vmem:[%s4118_s0 + $0xf8] sm:$0xff]  ;;  %v4313_v30 = vmov 1   ;;  %v3059_v20 = vsel %vm766_vm15, %v767_v63, %v765_v28  ;;  %vm920_vm3 = vcmp.eq.f32.partialorder %v2742_v22, inf }
 0x106   :  { %4312 = vst [vmem:[#allocation43_spill] sm:$0xff] %v3053_v3  ;;  %v833_v12 = vsub.f32 1.5, %v832_v26  ;;  %v891_v50 = vmul.f32 %v2987_v55, %v890_v34  ;;  %v3066_v46 = vmax.f32 %v1617_v29, 0.0  ;;  %v1620_v41 = vsub.f32 10.0, %v888_v39  ;;  %v1949_v29 = vld [vmem:[%s4118_s0 + $0x10] sm:$0xff] }
 0x107   :  { %1311 = vperm.xlu1 %1874, %v3053_v3   ;;  %1875 = vset.pattern.permute.xlu2 %v4313_v30  ;;  %v918_v3 = vmul.f32 %v2912_v7, %v917_v18  ;;  %v857_v21 = vsub.f32 1.5, %v856_v31  ;;  %v1615_v63 = vsub.f32 10.0, %v828_v19  ;;  %v1613_v26 = vsub.f32 10.0, %v3047_v10  ;;  %v1950_v31 = vld [vmem:[%s4118_s0 + $0x18] sm:$0xff]  ;;  %v1951_v10 = vld [vmem:[%s4118_s0 + $0x48] sm:$0xff] }
 0x108   :  { %v3064_v33 = vpop.permute.xlu1 %1124  ;;  %1380 = vperm.xlu2 %1875, %v1347_v59   ;;  %v952_v57 = vmul.f32 0.5, %v951_v16  ;;  %1923 = vrsqrt.f32 %v2646_v14  ;;  %v3073_v34 = vpop.eup %1921  ;;  %vm140_vm4 = vcmp.gt.f32.partialorder %v1949_v29, 0.0  ;;  %vm141_vm5 = vcmp.gt.f32.partialorder %v1950_v31, 0.0  ;;  %v4316_v16 = vld [vmem:[#allocation16_spill] sm:$0xff]  ;;  %v4318_v31 = vld [vmem:[#allocation23_spill] sm:$0xff] }
 0x109   :  { %4314 = vst [vmem:[#allocation44_spill] sm:$0xff] %v3064_v33  ;;  %1398 = vperm.xlu0 %1876, %v1353_v43   ;;  %v3069_v52 = vpop.permute.xlu0 %1130  ;;  %v1188_v28 = vpop.permute.xlu2 %1187  ;;  %v1610_v7 = vsub.f32 10.0, %v3059_v20  ;;  %vm922_vm6 = vcmp.eq.f32.partialorder %v2742_v22, 0.0  ;;  %vm836_vm7 = vcmp.eq.f32.partialorder %v2744_v15, inf  ;;  %vm147_vm8 = vcmp.gt.f32.partialorder %v1951_v10, 0.0 }
 0x10a   :  { %4315 = vst [vmem:[#allocation45_spill] sm:$0xff] %v3069_v52  ;;  %v1315_v59 = vmul.f32 %v3041_v60, %v1188_v28  ;;  %v834_v18 = vmul.f32 %v2930_v53, %v833_v12  ;;  %v892_v39 = vmul.f32 0.5, %v891_v50  ;;  %1925 = vrsqrt.f32 %v2797_v9 }
 0x10b   :  { %v919_v20 = vmul.f32 %v918_v3, %v2742_v22  ;;  %v858_v28 = vmul.f32 %v2941_v56, %v857_v21  ;;  %vm1157_vm9 = vcmp.eq.s32.totalorder %v4318_v31, %v3000_v61  ;;  %v1349_v10 = vsel %vm140_vm4, 1, %v4303_v42  ;;  %v4328_v31 = vld [vmem:[#allocation32_spill] sm:$0xff] }
 0x10c   :  { %v3091_v43 = vmul.f32 %v1315_v59, %v4316_v16  ;;  %v1667_v19 = vmul.f32 %v2637_v1, %v1315_v59  ;;  %v1350_v53 = vsel %vm141_vm5, 1, %v4303_v42  ;;  %v953_v12 = vsub.f32 1.5, %v952_v57 }
 0x10d   :  { %v866_v50 = vmul.f32 %v3073_v34, %v2675_v45  ;;  %v1356_v3 = vsel %vm147_vm8, 1, %v4303_v42  ;;  %vm860_vm10 = vcmp.eq.f32.partialorder %v2845_v47, inf  ;;  %v863_v21 = vand.u32 2147483648, %v2845_v47 }
 0x10e   :  { %4317 = vst [vmem:[#allocation16_spill] sm:$0xff] %v3091_v43  ;;  %v3106_v1 = vsel %vm1154_vm2, 0.0, %v1667_v19  ;;  %vm838_vm11 = vcmp.eq.f32.partialorder %v2744_v15, 0.0  ;;  %v3112_v56 = vpop.eup %1923  ;;  %v3115_v57 = vmax.f32 %v1620_v41, 0.0  ;;  %vm862_vm12 = vcmp.eq.f32.partialorder %v2845_v47, 0.0 }
 0x10f   :  { %1877 = vset.pattern.permute.xlu1 %v4313_v30  ;;  %v835_v59 = vmul.f32 %v834_v18, %v2744_v15  ;;  %v893_v29 = vsub.f32 1.5, %v892_v39  ;;  %1927 = vrsqrt.f32 %v2724_v54  ;;  %v3122_v19 = vmax.f32 %v1615_v63, 0.0 }
 0x110   :  { %v3120_v16 = vpop.permute.xlu1 %1133  ;;  %1386 = vperm.xlu1 %1877, %v1349_v10   ;;  %1389 = vperm.xlu2 %1875, %v1350_v53   ;;  %v921_v8 = vsel %vm920_vm3, %v2742_v22, %v919_v20  ;;  %v859_v41 = vmul.f32 %v858_v28, %v2845_v47  ;;  %vm956_vm13 = vcmp.eq.f32.partialorder %v2908_v36, inf  ;;  %v3129_v30 = vpop.eup %1925  ;;  %v3133_v43 = vmax.f32 %v1610_v7, 0.0  ;;  %v1952_v28 = vld [vmem:[%s4118_s0 + $0x20] sm:$0xff] }
 0x111   :  { %4319 = vst [vmem:[#allocation46_spill] sm:$0xff] %v3120_v16  ;;  %1407 = vperm.xlu0 %1876, %v1356_v3   ;;  %v3131_v18 = vpop.permute.xlu0 %1139  ;;  %v1200_v39 = vpop.permute.xlu2 %1199  ;;  %v3135_v10 = vmax.f32 %v1613_v26, 0.0  ;;  %v954_v63 = vmul.f32 %v2973_v17, %v953_v12  ;;  %v867_v53 = vmul.f32 %v3073_v34, %v866_v50  ;;  %vm142_vm14 = vcmp.gt.f32.partialorder %v1952_v28, 0.0  ;;  %v1953_v3 = vld [vmem:[%s4118_s0 + $0x28] sm:$0xff]  ;;  %v1954_v17 = vld [vmem:[%s4118_s0 + $0x60] sm:$0xff] }
 0x112   :  { %4320 = vst [vmem:[#allocation47_spill] sm:$0xff] %v3131_v18  ;;  %v1318_v20 = vmul.f32 %v3041_v60, %v1200_v39  ;;  %vm143_vm15 = vcmp.gt.f32.partialorder %v1953_v3, 0.0  ;;  %vm896_vm0 = vcmp.eq.f32.partialorder %v2726_v49, inf  ;;  %v986_v26 = vmul.f32 %v3112_v56, %v2646_v14 }
 0x113   :  { %vm150_vm1 = vcmp.gt.f32.partialorder %v1954_v17, 0.0  ;;  %v4321_v7 = vand.u32 2147483648, %v2742_v22  ;;  %v837_v50 = vsel %vm836_vm7, %v2744_v15, %v835_v59  ;;  %v894_v39 = vmul.f32 %v2987_v55, %v893_v29  ;;  %v4323_v59 = vld [vmem:[#allocation28_spill] sm:$0xff] }
 0x114   :  { %v3161_v16 = vmul.f32 %v1318_v20, %v2469_v37  ;;  %v1670_v18 = vmul.f32 %v2807_v38, %v1318_v20  ;;  %v861_v33 = vsel %vm860_vm10, %v2845_v47, %v859_v41  ;;  %vm958_vm3 = vcmp.eq.f32.partialorder %v2908_v36, 0.0 }
 0x115   :  { %v924_v12 = vsel %vm922_vm6, %v4321_v7, %v921_v8  ;;  %v926_v8 = vmul.f32 %v3129_v30, %v2797_v9  ;;  %v3170_v7 = vpop.eup %1927  ;;  %vm1159_vm4 = vcmp.eq.s32.totalorder %v4323_v59, %v3000_v61  ;;  %v1351_v37 = vsel %vm142_vm14, 1, %v4303_v42 }
 0x116   :  { %4322 = vst [vmem:[#allocation48_spill] sm:$0xff] %v3161_v16  ;;  %v1352_v38 = vsel %vm143_vm15, 1, %v4303_v42  ;;  %v955_v55 = vmul.f32 %v954_v63, %v2908_v36  ;;  %v868_v29 = vmul.f32 0.5, %v867_v53  ;;  %v3182_v41 = vsel %vm1157_vm9, 0.0, %v1670_v18 }
 0x117   :  { %v1359_v20 = vsel %vm150_vm1, 1, %v4303_v42  ;;  %v959_v16 = vand.u32 2147483648, %v2908_v36  ;;  %v987_v48 = vmul.f32 %v3112_v56, %v986_v26  ;;  %v1623_v28 = vsub.f32 10.0, %v924_v12 }
 0x118   :  { %v4324_v52 = vand.u32 2147483648, %v2744_v15  ;;  %v895_v63 = vmul.f32 %v894_v39, %v2726_v49  ;;  %1929 = vrsqrt.f32 %v2799_v44  ;;  %v3194_v53 = vpop.permute.xlu1 %1142  ;;  %1392 = vperm.xlu1 %1877, %v1351_v37   ;;  %1395 = vperm.xlu2 %1875, %v1352_v38   ;;  %v864_v18 = vsel %vm862_vm12, %v863_v21, %v861_v33  ;;  %v1956_v37 = vld [vmem:[%s4118_s0 + $0x40] sm:$0xff] }
 0x119   :  { %4325 = vst [vmem:[#allocation49_spill] sm:$0xff] %v3194_v53  ;;  %v927_v17 = vmul.f32 %v3129_v30, %v926_v8  ;;  %v902_v26 = vmul.f32 %v3170_v7, %v2724_v54  ;;  %1931 = vrsqrt.f32 %v2824_v11  ;;  %1416 = vperm.xlu0 %1876, %v1359_v20   ;;  %v1208_v12 = vpop.permute.xlu2 %1207  ;;  %vm898_vm5 = vcmp.eq.f32.partialorder %v2726_v49, 0.0  ;;  %v1955_v8 = vld [vmem:[%s4118_s0 + $0x38] sm:$0xff] }
 0x11a   :  { %v840_v3 = vsel %vm838_vm11, %v4324_v52, %v837_v50  ;;  %v3202_v52 = vpop.permute.xlu0 %1148  ;;  %v957_v50 = vsel %vm956_vm13, %v2908_v36, %v955_v55  ;;  %v899_v39 = vand.u32 2147483648, %v2726_v49  ;;  %v869_v33 = vsub.f32 1.5, %v868_v29  ;;  %v1957_v55 = vld [vmem:[%s4118_s0 + $0x78] sm:$0xff] }
 0x11b   :  { %4326 = vst [vmem:[#allocation50_spill] sm:$0xff] %v3202_v52  ;;  %v1320_v21 = vmul.f32 %v3041_v60, %v1208_v12  ;;  %vm145_vm6 = vcmp.gt.f32.partialorder %v1955_v8, 0.0  ;;  %vm146_vm7 = vcmp.gt.f32.partialorder %v1956_v37, 0.0  ;;  %v988_v38 = vmul.f32 0.5, %v987_v48 }
 0x11c   :  { %vm153_vm8 = vcmp.gt.f32.partialorder %v1957_v55, 0.0  ;;  %v1618_v20 = vsub.f32 10.0, %v864_v18  ;;  %v1616_v29 = vsub.f32 10.0, %v840_v3  ;;  %v897_v12 = vsel %vm896_vm0, %v2726_v49, %v895_v63 }
 0x11d   :  { %v3223_v53 = vmul.f32 %v1320_v21, %v2570_v2  ;;  %v1672_v8 = vmul.f32 %v2927_v23, %v1320_v21  ;;  %v928_v52 = vmul.f32 0.5, %v927_v17  ;;  %v903_v37 = vmul.f32 %v3170_v7, %v902_v26 }
 0x11e   :  { %v3227_v48 = vpop.eup %1929  ;;  %vm4189_vm10 = vcmp.eq.s32.totalorder %v4328_v31, %v3000_v61  ;;  %v1354_v18 = vsel %vm145_vm6, 1, %v4303_v42  ;;  %v1355_v3 = vsel %vm146_vm7, 1, %v4303_v42  ;;  %v3233_v15 = vmax.f32 %v1623_v28, 0.0 }
 0x11f   :  { %4327 = vst [vmem:[#allocation51_spill] sm:$0xff] %v3223_v53  ;;  %v960_v2 = vsel %vm958_vm3, %v959_v16, %v957_v50  ;;  %v3237_v63 = vpop.eup %1931  ;;  %vm1155_vm11 = vcmp.eq.s32.totalorder %v2658_v32, %v3000_v61  ;;  %v3244_v23 = vsel %vm1159_vm4, 0.0, %v1672_v8  ;;  %v1362_v17 = vsel %vm153_vm8, 1, %v4303_v42  ;;  %v4341_v32 = vld [vmem:[#allocation37_spill] sm:$0xff] }
 0x120   :  { %v870_v26 = vmul.f32 %v3073_v34, %v869_v33  ;;  %v989_v28 = vsub.f32 1.5, %v988_v38  ;;  %v3249_v21 = vmax.f32 %v1618_v20, 0.0  ;;  %v3251_v53 = vmax.f32 %v1616_v29, 0.0  ;;  %v3257_v59 = vpop.permute.xlu1 %1151  ;;  %1401 = vperm.xlu1 %1877, %v1354_v18   ;;  %1404 = vperm.xlu2 %1875, %v1355_v3   ;;  %v1958_v34 = vld [vmem:[%s4118_s0 + $0x50] sm:$0xff]  ;;  %v1959_v33 = vld [vmem:[%s4118_s0 + $0x58] sm:$0xff] }
 0x121   :  { %v900_v16 = vsel %vm898_vm5, %v899_v39, %v897_v12  ;;  %vm872_vm12 = vcmp.eq.f32.partialorder %v2675_v45, inf  ;;  %4329 = vst [vmem:[#allocation52_spill] sm:$0xff] %v3257_v59  ;;  %vm148_vm13 = vcmp.gt.f32.partialorder %v1958_v34, 0.0  ;;  %vm149_vm14 = vcmp.gt.f32.partialorder %v1959_v33, 0.0  ;;  %1425 = vperm.xlu0 %1876, %v1362_v17   ;;  %v1220_v55 = vpop.permute.xlu2 %1219  ;;  %v1960_v17 = vld [vmem:[%s4118_s0 + $0x90] sm:$0xff]  ;;  %v4332_v34 = vld [vmem:[#allocation18_spill] sm:$0xff] }
 0x122   :  { %v929_v38 = vsub.f32 1.5, %v928_v52  ;;  %v904_v39 = vmul.f32 0.5, %v903_v37  ;;  %v1626_v20 = vsub.f32 10.0, %v960_v2  ;;  %v1022_v29 = vmul.f32 %v3227_v48, %v2799_v44  ;;  %v1192_v18 = vpop.permute.xlu0 %1191 }
 0x123   :  { %v962_v12 = vmul.f32 %v3237_v63, %v2824_v11  ;;  %1933 = vrsqrt.f32 %v2835_v0  ;;  %v1323_v8 = vmul.f32 %v3041_v60, %v1220_v55  ;;  %v1621_v3 = vsub.f32 10.0, %v900_v16 }
 0x124   :  { %v871_v50 = vmul.f32 %v870_v26, %v2675_v45  ;;  %v990_v52 = vmul.f32 %v3112_v56, %v989_v28  ;;  %v1316_v37 = vmul.f32 %v3041_v60, %v1192_v18  ;;  %v1357_v2 = vsel %vm148_vm13, 1, %v4303_v42 }
 0x125   :  { %vm156_vm15 = vcmp.gt.f32.partialorder %v1960_v17, 0.0  ;;  %v1358_v59 = vsel %vm149_vm14, 1, %v4303_v42  ;;  %v3282_v55 = vmul.f32 %v1323_v8, %v2417_v58  ;;  %v1675_v26 = vmul.f32 %v2682_v25, %v1323_v8  ;;  %v4333_v25 = vld [vmem:[#allocation39_spill] sm:$0xff] }
 0x126   :  { %v930_v56 = vmul.f32 %v3129_v30, %v929_v38  ;;  %v905_v28 = vsub.f32 1.5, %v904_v39  ;;  %vm4191_vm0 = vcmp.eq.s32.totalorder %v2650_v51, %v3000_v61  ;;  %vm4190_vm1 = vcmp.eq.s32.totalorder %v2652_v40, %v3000_v61 }
 0x127   :  { %4330 = vst [vmem:[#allocation53_spill] sm:$0xff] %v3282_v55  ;;  %v3291_v16 = vmul.f32 %v1316_v37, %v2431_v35  ;;  %v1668_v33 = vmul.f32 %v4332_v34, %v1316_v37  ;;  %v1023_v18 = vmul.f32 %v3227_v48, %v1022_v29  ;;  %v963_v58 = vmul.f32 %v3237_v63, %v962_v12  ;;  %v1961_v12 = vld [vmem:[%s4118_s0 + $0x68] sm:$0xff]  ;;  %v1962_v34 = vld [vmem:[%s4118_s0 + $0x70] sm:$0xff] }
 0x128   :  { %vm4198_vm3 = vcmp.eq.s32.totalorder %v4333_v25, %v3000_v61  ;;  %v3301_v30 = vsel %vm4189_vm10, 0.0, %v1675_v26  ;;  %v1365_v38 = vsel %vm156_vm15, 1, %v4303_v42  ;;  %vm874_vm5 = vcmp.eq.f32.partialorder %v2675_v45, 0.0  ;;  %1410 = vperm.xlu1 %1877, %v1357_v2   ;;  %1413 = vperm.xlu2 %1875, %v1358_v59  }
 0x129   :  { %4331 = vst [vmem:[#allocation54_spill] sm:$0xff] %v3291_v16  ;;  %v3307_v8 = vpop.eup %1933  ;;  %v1700_v29 = vsel %vm1155_vm11, 0.0, %v1668_v33  ;;  %vm151_vm6 = vcmp.gt.f32.partialorder %v1961_v12, 0.0  ;;  %v3315_v37 = vmax.f32 %v1626_v20, 0.0  ;;  %v3317_v17 = vmax.f32 %v1621_v3, 0.0  ;;  %1434 = vperm.xlu0 %1876, %v1365_v38   ;;  %v1196_v33 = vpop.permute.xlu1 %1195 }
 0x12a   :  { %vm992_vm7 = vcmp.eq.f32.partialorder %v2646_v14, inf  ;;  %vm932_vm8 = vcmp.eq.f32.partialorder %v2797_v9, inf  ;;  %v1768_v26 = vadd.f32 %v1700_v29, %v3106_v1  ;;  %vm152_vm13 = vcmp.gt.f32.partialorder %v1962_v34, 0.0  ;;  %v1232_v39 = vpop.permute.xlu2 %1231  ;;  %v1212_v31 = vpop.permute.xlu0 %1211 }
 0x12b   :  { %4334 = vst [vmem:[#allocation18_spill] sm:$0xff] %v3317_v17  ;;  %v873_v20 = vsel %vm872_vm12, %v2675_v45, %v871_v50  ;;  %v991_v3 = vmul.f32 %v990_v52, %v2646_v14  ;;  %v931_v35 = vmul.f32 %v930_v56, %v2797_v9  ;;  %v906_v1 = vmul.f32 %v3170_v7, %v905_v28  ;;  %v1963_v56 = vld [vmem:[%s4118_s0 + $0xa8] sm:$0xff]  ;;  %v4335_v28 = vld [vmem:[#allocation20_spill] sm:$0xff]  ;;  %v4342_v17 = vld [vmem:[#allocation38_spill] sm:$0xff] }
 0x12c   :  { %v1024_v2 = vmul.f32 0.5, %v1023_v18  ;;  %v964_v59 = vmul.f32 0.5, %v963_v58  ;;  %v1317_v29 = vmul.f32 %v3041_v60, %v1196_v33  ;;  %v1326_v55 = vmul.f32 %v3041_v60, %v1232_v39  ;;  %v4337_v58 = vld [vmem:[#allocation22_spill] sm:$0xff]  ;;  %v4338_v39 = vld [vmem:[#allocation24_spill] sm:$0xff]  ;;  %v4340_v33 = vld [vmem:[#allocation11_spill] sm:$0xff] }
 0x12d   :  { %v1360_v16 = vsel %vm151_vm6, 1, %v4303_v42  ;;  %v938_v50 = vmul.f32 %v3307_v8, %v2835_v0  ;;  %v1321_v52 = vmul.f32 %v3041_v60, %v1212_v31  ;;  %vm159_vm12 = vcmp.gt.f32.partialorder %v1963_v56, 0.0 }
 0x12e   :  { %v1361_v7 = vsel %vm152_vm13, 1, %v4303_v42  ;;  %1935 = vrsqrt.f32 %v2914_v5  ;;  %v3345_v18 = vmul.f32 %v1317_v29, %v4335_v28  ;;  %v1669_v38 = vmul.f32 %v4337_v58, %v1317_v29  ;;  %v4343_v29 = vld [vmem:[#allocation2_spill] sm:$0xff] }
 0x12f   :  { %v3349_v12 = vmul.f32 %v1326_v55, %v4338_v39  ;;  %v1678_v31 = vmul.f32 %v4340_v33, %v1326_v55  ;;  %vm4195_vm14 = vcmp.eq.s32.totalorder %v4341_v32, %v3000_v61  ;;  %vm4193_vm15 = vcmp.eq.s32.totalorder %v4342_v17, %v3000_v61  ;;  %v1965_v39 = vld [vmem:[%s4118_s0 + $0x88] sm:$0xff]  ;;  %v4356_v32 = vld [vmem:[#allocation30_spill] sm:$0xff] }
 0x130   :  { %4336 = vst [vmem:[#allocation39_spill] sm:$0xff] %v3345_v18  ;;  %v3357_v34 = vmul.f32 %v1321_v52, %v2626_v27  ;;  %v1673_v49 = vmul.f32 %v2969_v62, %v1321_v52  ;;  %v1025_v28 = vsub.f32 1.5, %v1024_v2  ;;  %v965_v18 = vsub.f32 1.5, %v964_v59  ;;  %1419 = vperm.xlu1 %1877, %v1360_v16   ;;  %1422 = vperm.xlu2 %1875, %v1361_v7  }
 0x131   :  { %4339 = vst [vmem:[#allocation20_spill] sm:$0xff] %v3349_v12  ;;  %vm4196_vm6 = vcmp.eq.s32.totalorder %v4343_v29, %v3000_v61  ;;  %v1701_v55 = vsel %vm4191_vm0, 0.0, %v1669_v38  ;;  %v3368_v58 = vsel %vm4190_vm1, 0.0, %v1678_v31  ;;  %v1368_v27 = vsel %vm159_vm12, 1, %v4303_v42  ;;  %v1204_v16 = vpop.permute.xlu1 %1203 }
 0x132   :  { %vm994_vm13 = vcmp.eq.f32.partialorder %v2646_v14, 0.0  ;;  %vm934_vm10 = vcmp.eq.f32.partialorder %v2797_v9, 0.0  ;;  %v1769_v2 = vadd.f32 %v1768_v26, %v1701_v55  ;;  %v3378_v59 = vsel %vm4198_vm3, 0.0, %v1673_v49  ;;  %v1964_v26 = vld [vmem:[%s4118_s0 + $0x80] sm:$0xff]  ;;  %1443 = vperm.xlu0 %1876, %v1368_v27   ;;  %v1244_v7 = vpop.permute.xlu2 %1243  ;;  %v4345_v27 = vld [vmem:[#allocation8_spill] sm:$0xff] }
 0x133   :  { %v4344_v52 = vand.u32 2147483648, %v2675_v45  ;;  %vm908_vm12 = vcmp.eq.f32.partialorder %v2724_v54, inf  ;;  %v939_v56 = vmul.f32 %v3307_v8, %v938_v50  ;;  %vm154_vm1 = vcmp.gt.f32.partialorder %v1964_v26, 0.0  ;;  %v4348_v26 = vld [vmem:[#allocation21_spill] sm:$0xff] }
 0x134   :  { %v993_v49 = vsel %vm992_vm7, %v2646_v14, %v991_v3  ;;  %v3398_v33 = vpop.eup %1935  ;;  %v1770_v50 = vadd.f32 %v1769_v2, %v3182_v41  ;;  %v907_v31 = vmul.f32 %v906_v1, %v2724_v54  ;;  %v1026_v55 = vmul.f32 %v3227_v48, %v1025_v28  ;;  %v1966_v48 = vld [vmem:[%s4118_s0 + $0xc0] sm:$0xff] }
 0x135   :  { %v3384_v38 = vsel %vm874_vm5, %v4344_v52, %v873_v20  ;;  %v933_v20 = vsel %vm932_vm8, %v2797_v9, %v931_v35  ;;  %v966_v52 = vmul.f32 %v3237_v63, %v965_v18  ;;  %v1319_v3 = vmul.f32 %v3041_v60, %v1204_v16  ;;  %v1224_v35 = vpop.permute.xlu0 %1223  ;;  %v4349_v16 = vld [vmem:[#allocation3_spill] sm:$0xff] }
 0x136   :  { %v1329_v62 = vmul.f32 %v3041_v60, %v1244_v7  ;;  %vm155_vm5 = vcmp.gt.f32.partialorder %v1965_v39, 0.0  ;;  %1937 = vrsqrt.f32 %v4345_v27  ;;  %v1324_v41 = vmul.f32 %v3041_v60, %v1224_v35 }
 0x137   :  { %v1363_v1 = vsel %vm154_vm1, 1, %v4303_v42  ;;  %vm162_vm7 = vcmp.gt.f32.partialorder %v1966_v48, 0.0  ;;  %v3416_v63 = vmul.f32 0.5, %v939_v56  ;;  %v3419_v18 = vmul.f32 %v1319_v3, %v2615_v6  ;;  %v4350_v56 = vld [vmem:[#allocation41_spill] sm:$0xff] }
 0x138   :  { %v1671_v28 = vmul.f32 %v2949_v4, %v1319_v3  ;;  %v3423_v2 = vmul.f32 %v1329_v62, %v2699_v24  ;;  %v1681_v39 = vmul.f32 %v3066_v46, %v1329_v62  ;;  %vm4201_vm1 = vcmp.eq.s32.totalorder %v4348_v26, %v3000_v61  ;;  %v4351_v24 = vld [vmem:[#allocation4_spill] sm:$0xff]  ;;  %1428 = vperm.xlu1 %1877, %v1363_v1  }
 0x139   :  { %4346 = vst [vmem:[#allocation22_spill] sm:$0xff] %v3419_v18  ;;  %vm4200_vm8 = vcmp.eq.s32.totalorder %v4349_v16, %v3000_v61  ;;  %v3431_v7 = vmul.f32 %v1324_v41, %v2500_v13  ;;  %v1676_v35 = vmul.f32 %v4350_v56, %v1324_v41  ;;  %v1364_v6 = vsel %vm155_vm5, 1, %v4303_v42 }
 0x13a   :  { %4347 = vst [vmem:[#allocation24_spill] sm:$0xff] %v3423_v2  ;;  %v998_v4 = vmul.f32 %v3398_v33, %v2914_v5  ;;  %vm1166_vm0 = vcmp.eq.s32.totalorder %v4351_v24, %v3000_v61  ;;  %v1703_v46 = vsel %vm4195_vm14, 0.0, %v1671_v28  ;;  %v3445_v62 = vsel %vm4193_vm15, 0.0, %v1681_v39  ;;  %1431 = vperm.xlu2 %1875, %v1364_v6   ;;  %v4354_v6 = vld [vmem:[#allocation9_spill] sm:$0xff] }
 0x13b   :  { %v1371_v13 = vsel %vm162_vm7, 1, %v4303_v42  ;;  %v1619_v3 = vsub.f32 10.0, %v3384_v38  ;;  %v1771_v41 = vadd.f32 %v1770_v50, %v1703_v46  ;;  %v3452_v48 = vsel %vm4196_vm6, 0.0, %v1676_v35  ;;  %v1256_v46 = vpop.permute.xlu2 %1255 }
 0x13c   :  { %v4352_v56 = vand.u32 2147483648, %v2646_v14  ;;  %v4353_v2 = vand.u32 2147483648, %v2797_v9  ;;  %vm910_vm5 = vcmp.eq.f32.partialorder %v2724_v54, 0.0  ;;  %vm1028_vm7 = vcmp.eq.f32.partialorder %v2799_v44, inf  ;;  %v3468_v38 = vpop.eup %1937  ;;  %1452 = vperm.xlu0 %1876, %v1371_v13   ;;  %v1969_v13 = vld [vmem:[%s4118_s0 + $0xd8] sm:$0xff] }
 0x13d   :  { %v909_v50 = vsel %vm908_vm12, %v2724_v54, %v907_v31  ;;  %v967_v35 = vmul.f32 %v966_v52, %v2824_v11  ;;  %v999_v1 = vmul.f32 %v3398_v33, %v998_v4  ;;  %1939 = vrsqrt.f32 %v4354_v6  ;;  %v1967_v52 = vld [vmem:[%s4118_s0 + $0x98] sm:$0xff] }
 0x13e   :  { %v3458_v28 = vsel %vm994_vm13, %v4352_v56, %v993_v49  ;;  %v3464_v39 = vsel %vm934_vm10, %v4353_v2, %v933_v20  ;;  %v1027_v49 = vmul.f32 %v1026_v55, %v2799_v44  ;;  %vm968_vm13 = vcmp.eq.f32.partialorder %v2824_v11, inf  ;;  %v1216_v2 = vpop.permute.xlu1 %1215  ;;  %v1236_v55 = vpop.permute.xlu0 %1235 }
 0x13f   :  { %v1772_v20 = vadd.f32 %v1771_v41, %v3244_v23  ;;  %v941_v56 = vsub.f32 1.5, %v3416_v63  ;;  %v1322_v17 = vmul.f32 %v3041_v60, %v1216_v2  ;;  %v1332_v31 = vmul.f32 %v3041_v60, %v1256_v46  ;;  %v1968_v23 = vld [vmem:[%s4118_s0 + $0xa0] sm:$0xff]  ;;  %v4355_v2 = vld [vmem:[#allocation17_spill] sm:$0xff] }
 0x140   :  { %vm157_vm10 = vcmp.gt.f32.partialorder %v1967_v52, 0.0  ;;  %vm158_vm12 = vcmp.gt.f32.partialorder %v1968_v23, 0.0  ;;  %v1327_v4 = vmul.f32 %v3041_v60, %v1236_v55  ;;  %vm165_vm15 = vcmp.gt.f32.partialorder %v1969_v13, 0.0  ;;  %v4359_v55 = vld [vmem:[#allocation5_spill] sm:$0xff]  ;;  %v4360_v23 = vld [vmem:[#allocation36_spill] sm:$0xff] }
 0x141   :  { %v1773_v63 = vadd.f32 %v1772_v20, %v3378_v59  ;;  %v974_v41 = vmul.f32 %v3468_v38, %v4345_v27  ;;  %v3496_v46 = vmul.f32 %v1322_v17, %v4355_v2  ;;  %v1674_v18 = vmul.f32 %v3133_v43, %v1322_v17  ;;  %v4358_v20 = vld [vmem:[#allocation29_spill] sm:$0xff] }
 0x142   :  { %v3500_v12 = vmul.f32 %v1332_v31, %v4356_v32  ;;  %v1684_v59 = vmul.f32 %v3115_v57, %v1332_v31  ;;  %vm4210_vm14 = vcmp.eq.s32.totalorder %v4358_v20, %v3000_v61  ;;  %vm4204_vm6 = vcmp.eq.s32.totalorder %v4359_v55, %v3000_v61  ;;  %v4361_v32 = vld [vmem:[#allocation6_spill] sm:$0xff] }
 0x143   :  { %v3508_v13 = vmul.f32 %v1327_v4, %v4360_v23  ;;  %v1679_v40 = vmul.f32 %v3122_v19, %v1327_v4  ;;  %v1366_v2 = vsel %vm157_vm10, 1, %v4303_v42  ;;  %v1367_v43 = vsel %vm158_vm12, 1, %v4303_v42  ;;  %v3526_v52 = vpop.eup %1939 }
 0x144   :  { %4357 = vst [vmem:[#allocation11_spill] sm:$0xff] %v3500_v12  ;;  %vm1169_vm3 = vcmp.eq.s32.totalorder %v4361_v32, %v3000_v61  ;;  %v1706_v57 = vsel %vm4201_vm1, 0.0, %v1674_v18  ;;  %v3522_v17 = vsel %vm4200_vm8, 0.0, %v1684_v59  ;;  %v1374_v31 = vsel %vm165_vm15, 1, %v4303_v42  ;;  %1437 = vperm.xlu1 %1877, %v1366_v2   ;;  %1440 = vperm.xlu2 %1875, %v1367_v43   ;;  %v1268_v2 = vpop.permute.xlu2 %1267 }
 0x145   :  { %v1774_v4 = vadd.f32 %v1773_v63, %v1706_v57  ;;  %v3531_v23 = vsel %vm1166_vm0, 0.0, %v1679_v40  ;;  %v3533_v12 = vmax.f32 %v1619_v3, 0.0  ;;  %v1629_v18 = vsub.f32 10.0, %v3458_v28  ;;  %1461 = vperm.xlu0 %1876, %v1374_v31   ;;  %v4363_v31 = vld [vmem:[#allocation33_spill] sm:$0xff] }
 0x146   :  { %vm1030_vm10 = vcmp.eq.f32.partialorder %v2799_v44, 0.0  ;;  %v1624_v59 = vsub.f32 10.0, %v3464_v39  ;;  %v4362_v19 = vand.u32 2147483648, %v2724_v54  ;;  %v1029_v40 = vsel %vm1028_vm7, %v2799_v44, %v1027_v49  ;;  %v1228_v39 = vpop.permute.xlu1 %1227  ;;  %v1248_v16 = vpop.permute.xlu0 %1247 }
 0x147   :  { %v969_v3 = vsel %vm968_vm13, %v2824_v11, %v967_v35  ;;  %vm970_vm15 = vcmp.eq.f32.partialorder %v2824_v11, 0.0  ;;  %v1775_v28 = vadd.f32 %v1774_v4, %v3301_v30  ;;  %v942_v43 = vmul.f32 %v3307_v8, %v941_v56  ;;  %v1970_v35 = vld [vmem:[%s4118_s0 + $0xb0] sm:$0xff]  ;;  %v1971_v30 = vld [vmem:[%s4118_s0 + $0xb8] sm:$0xff] }
 0x148   :  { %v3542_v63 = vsel %vm910_vm5, %v4362_v19, %v909_v50  ;;  %v1000_v57 = vmul.f32 0.5, %v999_v1  ;;  %v975_v50 = vmul.f32 %v3468_v38, %v974_v41  ;;  %v1325_v19 = vmul.f32 %v3041_v60, %v1228_v39  ;;  %v1972_v1 = vld [vmem:[%s4118_s0 + $0xf0] sm:$0xff] }
 0x149   :  { %v1335_v49 = vmul.f32 %v3041_v60, %v1268_v2  ;;  %vm160_vm5 = vcmp.gt.f32.partialorder %v1970_v35, 0.0  ;;  %vm161_vm7 = vcmp.gt.f32.partialorder %v1971_v30, 0.0  ;;  %v1776_v8 = vadd.f32 %v1775_v28, %v3452_v48  ;;  %v4367_v28 = vld [vmem:[#allocation27_spill] sm:$0xff] }
 0x14a   :  { %v1330_v56 = vmul.f32 %v3041_v60, %v1248_v16  ;;  %vm168_vm13 = vcmp.gt.f32.partialorder %v1972_v1, 0.0  ;;  %v1034_v41 = vmul.f32 %v3526_v52, %v4354_v6  ;;  %v3570_v4 = vmul.f32 %v1325_v19, %v4363_v31  ;;  %v4366_v16 = vld [vmem:[#allocation26_spill] sm:$0xff] }
 0x14b   :  { %v1677_v39 = vmul.f32 %v3135_v10, %v1325_v19  ;;  %v3574_v2 = vmul.f32 %v1335_v49, %v2742_v22  ;;  %v1687_v48 = vmul.f32 %v3233_v15, %v1335_v49  ;;  %vm4207_vm12 = vcmp.eq.s32.totalorder %v4366_v16, %v3000_v61  ;;  %v4369_v22 = vld [vmem:[#allocation15_spill] sm:$0xff] }
 0x14c   :  { %4364 = vst [vmem:[#allocation2_spill] sm:$0xff] %v3570_v4  ;;  %vm4206_vm8 = vcmp.eq.s32.totalorder %v4367_v28, %v3000_v61  ;;  %v3582_v30 = vmul.f32 %v1330_v56, %v2845_v47  ;;  %v1682_v1 = vmul.f32 %v3249_v21, %v1330_v56  ;;  %v1369_v31 = vsel %vm160_vm5, 1, %v4303_v42  ;;  %v4370_v21 = vld [vmem:[#allocation7_spill] sm:$0xff] }
 0x14d   :  { %4365 = vst [vmem:[#allocation8_spill] sm:$0xff] %v3574_v2  ;;  %v1370_v10 = vsel %vm161_vm7, 1, %v4303_v42  ;;  %vm4209_vm1 = vcmp.eq.s32.totalorder %v4369_v22, %v3000_v61  ;;  %v1709_v15 = vsel %vm4210_vm14, 0.0, %v1677_v39  ;;  %v3596_v19 = vsel %vm4204_vm6, 0.0, %v1687_v48  ;;  %1446 = vperm.xlu1 %1877, %v1369_v31  }
 0x14e   :  { %4368 = vst [vmem:[#allocation21_spill] sm:$0xff] %v3582_v30  ;;  %v1377_v47 = vsel %vm168_vm13, 1, %v4303_v42  ;;  %1941 = vrsqrt.f32 %v4370_v21  ;;  %v1777_v49 = vadd.f32 %v1776_v8, %v1709_v15  ;;  %v3603_v35 = vsel %vm1169_vm3, 0.0, %v1682_v1  ;;  %1449 = vperm.xlu2 %1875, %v1370_v10   ;;  %v1280_v1 = vpop.permute.xlu2 %1279 }
 0x14f   :  { %v1001_v56 = vsub.f32 1.5, %v1000_v57  ;;  %v1035_v2 = vmul.f32 %v3526_v52, %v1034_v41  ;;  %v3606_v39 = vmax.f32 %v1629_v18, 0.0  ;;  %v3608_v55 = vmax.f32 %v1624_v59, 0.0  ;;  %1470 = vperm.xlu0 %1876, %v1377_v47   ;;  %v1240_v41 = vpop.permute.xlu1 %1239  ;;  %v1974_v47 = vld [vmem:[%s4118_s0 + $0xd0] sm:$0xff] }
 0x150   :  { %v4371_v4 = vand.u32 2147483648, %v2799_v44  ;;  %vm944_vm5 = vcmp.eq.f32.partialorder %v2835_v0, inf  ;;  %v1778_v57 = vadd.f32 %v1777_v49, %v3368_v58  ;;  %v4372_v18 = vand.u32 2147483648, %v2824_v11  ;;  %v1973_v58 = vld [vmem:[%s4118_s0 + $0xc8] sm:$0xff] }
 0x151   :  { %v943_v31 = vmul.f32 %v942_v43, %v2835_v0  ;;  %v976_v10 = vmul.f32 0.5, %v975_v50  ;;  %v1328_v15 = vmul.f32 %v3041_v60, %v1240_v41  ;;  %vm164_vm7 = vcmp.gt.f32.partialorder %v1974_v47, 0.0  ;;  %v4376_v47 = vld [vmem:[#allocation31_spill] sm:$0xff] }
 0x152   :  { %v3615_v8 = vsel %vm1030_vm10, %v4371_v4, %v1029_v40  ;;  %v3623_v59 = vsel %vm970_vm15, %v4372_v18, %v969_v3  ;;  %v1338_v40 = vmul.f32 %v3041_v60, %v1280_v1  ;;  %v1260_v4 = vpop.permute.xlu0 %1259  ;;  %vm163_vm10 = vcmp.gt.f32.partialorder %v1973_v58, 0.0  ;;  %v4373_v1 = vld [vmem:[#allocation25_spill] sm:$0xff] }
 0x153   :  { %v1779_v3 = vadd.f32 %v1778_v57, %v3531_v23  ;;  %v1333_v43 = vmul.f32 %v3041_v60, %v1260_v4  ;;  %v1002_v50 = vmul.f32 %v3398_v33, %v1001_v56  ;;  %v1036_v49 = vmul.f32 0.5, %v1035_v2  ;;  %v4377_v23 = vld [vmem:[#allocation10_spill] sm:$0xff]  ;;  %v4378_v33 = vld [vmem:[#allocation40_spill] sm:$0xff] }
 0x154   :  { %v3637_v41 = vpop.eup %1941  ;;  %v3640_v18 = vmul.f32 %v1328_v15, %v4373_v1  ;;  %v1680_v48 = vmul.f32 %v3251_v53, %v1328_v15  ;;  %v3644_v20 = vmul.f32 %v1338_v40, %v2908_v36  ;;  %v1690_v30 = vmul.f32 %v3315_v37, %v1338_v40  ;;  %v4380_v56 = vld [vmem:[#allocation18_spill] sm:$0xff] }
 0x155   :  { %vm1170_vm15 = vcmp.eq.s32.totalorder %v4376_v47, %v3000_v61  ;;  %vm1180_vm13 = vcmp.eq.s32.totalorder %v4377_v23, %v3000_v61  ;;  %v3652_v2 = vmul.f32 %v1333_v43, %v4378_v33  ;;  %v1685_v57 = vmul.f32 %v4380_v56, %v1333_v43  ;;  %v4381_v36 = vld [vmem:[#allocation42_spill] sm:$0xff] }
 0x156   :  { %4374 = vst [vmem:[#allocation41_spill] sm:$0xff] %v3640_v18  ;;  %v1372_v4 = vsel %vm163_vm10, 1, %v4303_v42  ;;  %v1373_v53 = vsel %vm164_vm7, 1, %v4303_v42  ;;  %vm1175_vm6 = vcmp.eq.s32.totalorder %v4381_v36, %v3000_v61  ;;  %v1712_v37 = vsel %vm4207_vm12, 0.0, %v1680_v48  ;;  %v4382_v43 = vld [vmem:[#allocation14_spill] sm:$0xff] }
 0x157   :  { %4375 = vst [vmem:[#allocation4_spill] sm:$0xff] %v3644_v20  ;;  %v3666_v15 = vsel %vm4206_vm8, 0.0, %v1690_v30  ;;  %v947_v40 = vand.u32 2147483648, %v2835_v0  ;;  %1943 = vrsqrt.f32 %v4382_v43  ;;  %v1780_v58 = vadd.f32 %v1779_v3, %v1712_v37  ;;  %1455 = vperm.xlu1 %1877, %v1372_v4   ;;  %1458 = vperm.xlu2 %1875, %v1373_v53   ;;  %v1292_v20 = vpop.permute.xlu2 %1291  ;;  %v1975_v18 = vld [vmem:[%s4118_s0 + $0xe0] sm:$0xff] }
 0x158   :  { %4379 = vst [vmem:[#allocation9_spill] sm:$0xff] %v3652_v2  ;;  %v3673_v1 = vsel %vm4209_vm1, 0.0, %v1685_v57  ;;  %v977_v33 = vsub.f32 1.5, %v976_v10  ;;  %v1010_v56 = vmul.f32 %v3637_v41, %v4370_v21  ;;  %v1632_v48 = vsub.f32 10.0, %v3615_v8  ;;  %v1252_v57 = vpop.permute.xlu1 %1251 }
 0x159   :  { %v1627_v30 = vsub.f32 10.0, %v3623_v59  ;;  %vm946_vm10 = vcmp.eq.f32.partialorder %v2835_v0, 0.0  ;;  %vm1004_vm7 = vcmp.eq.f32.partialorder %v2914_v5, inf  ;;  %v1007_v3 = vand.u32 2147483648, %v2914_v5 }
 0x15a   :  { %v1781_v37 = vadd.f32 %v1780_v58, %v3445_v62  ;;  %v945_v10 = vsel %vm944_vm5, %v2835_v0, %v943_v31  ;;  %v1003_v4 = vmul.f32 %v1002_v50, %v2914_v5  ;;  %v1037_v53 = vsub.f32 1.5, %v1036_v49  ;;  %v1272_v28 = vpop.permute.xlu0 %1271  ;;  %v1976_v62 = vld [vmem:[%s4118_s0 + $0xe8] sm:$0xff] }
 0x15b   :  { %v1331_v8 = vmul.f32 %v3041_v60, %v1252_v57  ;;  %v1341_v59 = vmul.f32 %v3041_v60, %v1292_v20  ;;  %vm166_vm8 = vcmp.gt.f32.partialorder %v1975_v18, 0.0  ;;  %vm167_vm12 = vcmp.gt.f32.partialorder %v1976_v62, 0.0 }
 0x15c   :  { %v1782_v31 = vadd.f32 %v1781_v37, %v3603_v35  ;;  %v1336_v50 = vmul.f32 %v3041_v60, %v1272_v28  ;;  %v978_v49 = vmul.f32 %v3468_v38, %v977_v33  ;;  %v1011_v58 = vmul.f32 %v3637_v41, %v1010_v56  ;;  %v4384_v35 = vld [vmem:[#allocation13_spill] sm:$0xff]  ;;  %v4385_v28 = vld [vmem:[#allocation12_spill] sm:$0xff] }
 0x15d   :  { %v3699_v20 = vpop.eup %1943  ;;  %v3702_v57 = vmul.f32 %v1331_v8, %v2675_v45  ;;  %v1683_v16 = vmul.f32 %v3533_v12, %v1331_v8  ;;  %v3706_v2 = vmul.f32 %v1341_v59, %v2646_v14  ;;  %v1693_v62 = vmul.f32 %v3606_v39, %v1341_v59  ;;  %v4386_v14 = vld [vmem:[#allocation45_spill] sm:$0xff] }
 0x15e   :  { %vm1173_vm5 = vcmp.eq.s32.totalorder %v4384_v35, %v3000_v61  ;;  %vm4214_vm1 = vcmp.eq.s32.totalorder %v4385_v28, %v3000_v61  ;;  %v3714_v38 = vmul.f32 %v1336_v50, %v2797_v9  ;;  %v1688_v33 = vmul.f32 %v3608_v55, %v1336_v50 }
 0x15f   :  { %4383 = vst [vmem:[#allocation17_spill] sm:$0xff] %v3706_v2  ;;  %v1375_v45 = vsel %vm166_vm8, 1, %v4303_v42  ;;  %v1376_v12 = vsel %vm167_vm12, 1, %v4303_v42  ;;  %vm1178_vm14 = vcmp.eq.s32.totalorder %v4386_v14, %v3000_v61  ;;  %v1715_v39 = vsel %vm1170_vm15, 0.0, %v1683_v16 }
 0x160   :  { %v3728_v56 = vsel %vm1180_vm13, 0.0, %v1693_v62  ;;  %v1005_v9 = vsel %vm1004_vm7, %v2914_v5, %v1003_v4  ;;  %v1038_v55 = vmul.f32 %v3526_v52, %v1037_v53  ;;  %v1783_v18 = vadd.f32 %v1782_v31, %v1715_v39  ;;  %1464 = vperm.xlu1 %1877, %v1375_v45   ;;  %1467 = vperm.xlu2 %1875, %v1376_v12   ;;  %v1264_v4 = vpop.permute.xlu1 %1263  ;;  %v1304_v53 = vpop.permute.xlu2 %1303  ;;  %v4388_v39 = vld [vmem:[#allocation43_spill] sm:$0xff] }
 0x161   :  { %v1720_v37 = vsel %vm1175_vm6, 0.0, %v1688_v33  ;;  %v1012_v8 = vmul.f32 0.5, %v1011_v58  ;;  %v1046_v16 = vmul.f32 %v3699_v20, %v4382_v43  ;;  %v4387_v59 = vsub.f32 10.0, %v3542_v63 }
 0x162   :  { %v1664_v62 = vmax.f32 %v1632_v48, 0.0  ;;  %v1659_v2 = vmax.f32 %v1627_v30, 0.0  ;;  %vm1006_vm8 = vcmp.eq.f32.partialorder %v2914_v5, 0.0  ;;  %v1784_v52 = vadd.f32 %v1783_v18, %v3522_v17  ;;  %v1284_v63 = vpop.permute.xlu0 %1283 }
 0x163   :  { %v1654_v50 = vmax.f32 %v4387_v59, 0.0  ;;  %v948_v31 = vsel %vm946_vm10, %v947_v40, %v945_v10  ;;  %v1008_v58 = vsel %vm1006_vm8, %v1007_v3, %v1005_v9  ;;  %v979_v33 = vmul.f32 %v978_v49, %v4345_v27 }
 0x164   :  { %v1334_v45 = vmul.f32 %v3041_v60, %v1264_v4  ;;  %v1344_v12 = vmul.f32 %v3041_v60, %v1304_v53  ;;  %vm169_vm12 = vcmp.gt.f32.partialorder %v4388_v39, 0.0  ;;  %v1039_v48 = vmul.f32 %v1038_v55, %v4354_v6 }
 0x165   :  { %v1785_v30 = vadd.f32 %v1784_v52, %v3673_v1  ;;  %v1339_v17 = vmul.f32 %v3041_v60, %v1284_v63  ;;  %v1013_v18 = vsub.f32 1.5, %v1012_v8  ;;  %v1047_v59 = vmul.f32 %v3699_v20, %v1046_v16 }
 0x166   :  { %v3754_v40 = vmul.f32 %v1334_v45, %v2724_v54  ;;  %v1686_v3 = vmul.f32 %v1654_v50, %v1334_v45  ;;  %v3757_v10 = vmul.f32 %v1344_v12, %v2799_v44  ;;  %v1696_v49 = vmul.f32 %v1664_v62, %v1344_v12 }
 0x167   :  { %v3760_v9 = vmul.f32 %v1339_v17, %v2824_v11  ;;  %v1691_v4 = vmul.f32 %v1659_v2, %v1339_v17  ;;  %v1378_v55 = vsel %vm169_vm12, 1, %v4303_v42  ;;  %vm980_vm10 = vcmp.eq.f32.partialorder %v4345_v27, inf }
 0x168   :  { %v1718_v1 = vsel %vm1173_vm5, 0.0, %v1686_v3  ;;  %v3770_v54 = vsel %vm4214_vm1, 0.0, %v1696_v49  ;;  %v1625_v44 = vsub.f32 10.0, %v948_v31  ;;  %v1630_v8 = vsub.f32 10.0, %v1008_v58  ;;  %1473 = vperm.xlu1 %1877, %v1378_v55   ;;  %v1276_v31 = vpop.permute.xlu1 %1275  ;;  %v1381_v39 = vpop.permute.xlu2 %1380 }
 0x169   :  { %v1786_v16 = vadd.f32 %v1785_v30, %v1718_v1  ;;  %v1723_v11 = vsel %vm1178_vm14, 0.0, %v1691_v4  ;;  %v981_v42 = vsel %vm980_vm10, %v4345_v27, %v979_v33  ;;  %vm1040_vm7 = vcmp.eq.f32.partialorder %v4354_v6, inf  ;;  %v4393_v1 = vld [vmem:[#allocation16_spill] sm:$0xff] }
 0x16a   :  { %v983_v2 = vand.u32 2147483648, %v4345_v27  ;;  %v1041_v50 = vsel %vm1040_vm7, %v4354_v6, %v1039_v48  ;;  %v1014_v62 = vmul.f32 %v3637_v41, %v1013_v18  ;;  %v1048_v52 = vmul.f32 0.5, %v1047_v59  ;;  %v1296_v63 = vpop.permute.xlu0 %1295  ;;  %v4407_v59 = vld [vmem:[#allocation54_spill] sm:$0xff] }
 0x16b   :  { %v1787_v53 = vadd.f32 %v1786_v16, %v3596_v19  ;;  %vm982_vm8 = vcmp.eq.f32.partialorder %v4345_v27, 0.0  ;;  %vm1042_vm12 = vcmp.eq.f32.partialorder %v4354_v6, 0.0  ;;  %v1043_v58 = vand.u32 2147483648, %v4354_v6 }
 0x16c   :  { %v1657_v33 = vmax.f32 %v1625_v44, 0.0  ;;  %v1337_v45 = vmul.f32 %v3041_v60, %v1276_v31  ;;  %v1662_v12 = vmax.f32 %v1630_v8, 0.0  ;;  %v984_v30 = vsel %vm982_vm8, %v983_v2, %v981_v42  ;;  %v4394_v8 = vld [vmem:[#allocation47_spill] sm:$0xff] }
 0x16d   :  { %v1788_v48 = vadd.f32 %v1787_v53, %v1720_v37  ;;  %v1342_v41 = vmul.f32 %v3041_v60, %v1296_v63  ;;  %vm1475_vm10 = vcmp.eq.s32.totalorder %v1381_v39, 1  ;;  %v1044_v17 = vsel %vm1042_vm12, %v1043_v58, %v1041_v50  ;;  %v3800_v60 = vld [vmem:[%s4121_s4] ss:$0 sm:$0xff]  ;;  %v4392_v37 = vld [vmem:[#allocation44_spill] sm:$0xff] }
 0x16e   :  { %v3787_v19 = vmul.f32 %v1337_v45, %v2835_v0  ;;  %v1689_v18 = vmul.f32 %v1657_v33, %v1337_v45  ;;  %vm3792_vm7 = vmand %vm1154_vm2, %vm1475_vm10  ;;  %v1015_v49 = vmul.f32 %v1014_v62, %v4370_v21  ;;  %v1049_v4 = vsub.f32 1.5, %v1048_v52  ;;  %v1978_v45 = vld [vmem:[%s4120_s3] ss:$0 sm:$0xff] }
 0x16f   :  { %vm4211_vm8 = vcmp.eq.s32.totalorder %v4392_v37, %v3800_v60  ;;  %v3805_v0 = vmul.f32 %v1342_v41, %v2914_v5  ;;  %v1694_v55 = vmul.f32 %v1662_v12, %v1342_v41  ;;  %v1571_v44 = vsel %vm3792_vm7, %v4393_v1, 0.0  ;;  %v4400_v1 = vld [vmem:[#allocation50_spill] sm:$0xff] }
 0x170   :  { %vm4217_vm2 = vcmp.eq.s32.totalorder %v4394_v8, %v3800_v60  ;;  %v1721_v16 = vsel %vm4211_vm8, 0.0, %v1689_v18  ;;  %v1628_v42 = vsub.f32 10.0, %v984_v30  ;;  %v1633_v2 = vsub.f32 10.0, %v1044_v17  ;;  %v1288_v31 = vpop.permute.xlu1 %1287  ;;  %v1390_v30 = vpop.permute.xlu2 %1389 }
 0x171   :  { %v1789_v50 = vadd.f32 %v1788_v48, %v1721_v16  ;;  %v1726_v5 = vsel %vm4217_vm2, 0.0, %v1694_v55  ;;  %vm1016_vm12 = vcmp.eq.f32.partialorder %v4370_v21, inf  ;;  %v1050_v52 = vmul.f32 %v3699_v20, %v1049_v4  ;;  %v4399_v55 = vld [vmem:[#allocation48_spill] sm:$0xff] }
 0x172   :  { %v1017_v62 = vsel %vm1016_vm12, %v4370_v21, %v1015_v49  ;;  %v1019_v58 = vand.u32 2147483648, %v4370_v21  ;;  %v1660_v33 = vmax.f32 %v1628_v42, 0.0  ;;  %v1340_v12 = vmul.f32 %v1978_v45, %v1288_v31  ;;  %v1308_v39 = vpop.permute.xlu0 %1307  ;;  %v4398_v49 = vld [vmem:[#allocation46_spill] sm:$0xff] }
 0x173   :  { %v1790_v53 = vadd.f32 %v1789_v50, %v3666_v15  ;;  %v1665_v63 = vmax.f32 %v1633_v2, 0.0  ;;  %vm1018_vm10 = vcmp.eq.f32.partialorder %v4370_v21, 0.0  ;;  %v1345_v41 = vmul.f32 %v1978_v45, %v1308_v39 }
 0x174   :  { %vm1478_vm7 = vcmp.eq.s32.totalorder %v1390_v30, 1  ;;  %v1020_v20 = vsel %vm1018_vm10, %v1019_v58, %v1017_v62  ;;  %v3828_v15 = vmul.f32 %v1340_v12, %v4345_v27  ;;  %v1692_v17 = vmul.f32 %v1660_v33, %v1340_v12 }
 0x175   :  { %v1791_v48 = vadd.f32 %v1790_v53, %v1723_v11  ;;  %vm3833_vm12 = vmand %vm1157_vm9, %vm1478_vm7  ;;  %v1051_v3 = vmul.f32 %v1050_v52, %v4382_v43  ;;  %vm4212_vm8 = vcmp.eq.s32.totalorder %v4398_v49, %v3800_v60  ;;  %v3841_v11 = vmul.f32 %v1345_v41, %v4354_v6 }
 0x176   :  { %v1697_v4 = vmul.f32 %v1665_v63, %v1345_v41  ;;  %v1574_v27 = vsel %vm3833_vm12, %v4399_v55, 0.0  ;;  %vm4213_vm10 = vcmp.eq.s32.totalorder %v4400_v1, %v3800_v60  ;;  %v1724_v16 = vsel %vm4212_vm8, 0.0, %v1692_v17  ;;  %v4418_v17 = vld [vmem:[#allocation39_spill] sm:$0xff] }
 0x177   :  { %v1631_v42 = vsub.f32 10.0, %v1020_v20  ;;  %v1792_v2 = vadd.f32 %v1791_v48, %v1724_v16  ;;  %vm1052_vm9 = vcmp.eq.f32.partialorder %v4382_v43, inf  ;;  %v1055_v53 = vand.u32 2147483648, %v4382_v43  ;;  %v4404_v20 = vld [vmem:[#allocation49_spill] sm:$0xff] }
 0x178   :  { %v1729_v50 = vsel %vm4213_vm10, 0.0, %v1697_v4  ;;  %v1053_v6 = vsel %vm1052_vm9, %v4382_v43, %v1051_v3  ;;  %v1300_v52 = vpop.permute.xlu1 %1299  ;;  %v1396_v33 = vpop.permute.xlu2 %1395  ;;  %vm1054_vm7 = vcmp.eq.f32.partialorder %v4382_v43, 0.0  ;;  %vm4216_vm10 = vcmp.eq.s32.totalorder %v4404_v20, %v3800_v60 }
 0x179   :  { %v1793_v62 = vadd.f32 %v1792_v2, %v3728_v56  ;;  %v1663_v31 = vmax.f32 %v1631_v42, 0.0  ;;  %v1343_v58 = vmul.f32 %v1978_v45, %v1300_v52  ;;  %vm1480_vm12 = vcmp.eq.s32.totalorder %v1396_v33, 1 }
 0x17a   :  { %v1384_v63 = vpop.permute.xlu0 %1383  ;;  %v1056_v39 = vsel %vm1054_vm7, %v1055_v53, %v1053_v6  ;;  %vm3865_vm9 = vmand %vm1159_vm4, %vm1480_vm12  ;;  %vm4413_vm12 = vcmp.eq.s32.totalorder %v4333_v25, %v3000_v61 }
 0x17b   :  { %v1794_v12 = vadd.f32 %v1793_v62, %v1726_v5  ;;  %v3860_v30 = vmul.f32 %v1343_v58, %v4370_v21  ;;  %v1695_v48 = vmul.f32 %v1663_v31, %v1343_v58  ;;  %vm1476_vm8 = vcmp.eq.s32.totalorder %v1384_v63, 1  ;;  %v4406_v5 = vld [vmem:[#allocation51_spill] sm:$0xff]  ;;  %v4408_v63 = vld [vmem:[#allocation32_spill] sm:$0xff] }
 0x17c   :  { %vm1508_vm1 = vmand %vm1155_vm11, %vm1476_vm8  ;;  %v1576_v21 = vsel %vm3865_vm9, %v4406_v5, 0.0  ;;  %v1634_v4 = vsub.f32 10.0, %v1056_v39 }
 0x17d   :  { %v1727_v18 = vsel %vm4216_vm10, 0.0, %v1695_v48  ;;  %v1572_v3 = vsel %vm1508_vm1, %v4407_v59, 0.0  ;;  %vm4409_vm1 = vcmp.eq.s32.totalorder %v4408_v63, %v3000_v61  ;;  %v4436_v63 = vld [vmem:[#allocation24_spill] sm:$0xff] }
 0x17e   :  { %v1795_v55 = vadd.f32 %v1794_v12, %v1727_v18  ;;  %v1731_v16 = vadd.f32 %v1572_v3, %v1571_v44  ;;  %v1666_v6 = vmax.f32 %v1634_v4, 0.0  ;;  %v4422_v3 = vld [vmem:[#allocation34_spill] sm:$0xff]  ;;  %v4426_v4 = vld [vmem:[#allocation20_spill] sm:$0xff] }
 0x180   :  { %v1796_v42 = vadd.f32 %v1795_v55, %v3770_v54  ;;  %v1312_v2 = vpop.permute.xlu1 %1311  ;;  %v1405_v52 = vpop.permute.xlu2 %1404  ;;  %v4412_v54 = vld [vmem:[#allocation52_spill] sm:$0xff] }
 0x181   :  { %v1346_v62 = vmul.f32 %v1978_v45, %v1312_v2  ;;  %vm1483_vm4 = vcmp.eq.s32.totalorder %v1405_v52, 1  ;;  %vm4215_vm7 = vcmp.eq.s32.totalorder %v4412_v54, %v3800_v60 }
 0x182   :  { %v1797_v53 = vadd.f32 %v1796_v42, %v1729_v50  ;;  %v1399_v31 = vpop.permute.xlu0 %1398  ;;  %vm3888_vm8 = vmand %vm4409_vm1, %vm1483_vm4  ;;  %vm4417_vm1 = vcmp.eq.s32.totalorder %v2650_v51, %v3000_v61 }
 0x183   :  { %v3883_v58 = vmul.f32 %v1346_v62, %v4382_v43  ;;  %v1698_v33 = vmul.f32 %v1666_v6, %v1346_v62  ;;  %vm1481_vm11 = vcmp.eq.s32.totalorder %v1399_v31, 1  ;;  %v4416_v43 = vld [vmem:[#allocation53_spill] sm:$0xff]  ;;  %v4432_v31 = vld [vmem:[#allocation38_spill] sm:$0xff] }
 0x184   :  { %vm3897_vm9 = vmand %vm4413_vm12, %vm1481_vm11  ;;  %v1579_v45 = vsel %vm3888_vm8, %v4416_v43, 0.0  ;;  %v4427_v6 = vld [vmem:[#allocation37_spill] sm:$0xff] }
 0x185   :  { %v1730_v50 = vsel %vm4215_vm7, 0.0, %v1698_v33  ;;  %v1577_v39 = vsel %vm3897_vm9, %v3357_v34, 0.0  ;;  %vm4419_vm7 = vcmp.eq.s32.totalorder %v4343_v29, %v3000_v61  ;;  %vm4423_vm9 = vcmp.eq.s32.totalorder %v4422_v3, %v3000_v61 }
 0x186   :  { %v3910_v48 = vadd.f32 %v1797_v53, %v1730_v50 }
 0x188   :  { %v1387_v41 = vpop.permute.xlu1 %1386  ;;  %v1414_v25 = vpop.permute.xlu2 %1413 }
 0x189   :  { %vm1477_vm4 = vcmp.eq.s32.totalorder %v1387_v41, 1  ;;  %vm1486_vm11 = vcmp.eq.s32.totalorder %v1414_v25, 1  ;;  %v4467_v25 = vld [vmem:[#allocation4_spill] sm:$0xff] }
 0x18a   :  { %v1408_v56 = vpop.permute.xlu0 %1407  ;;  %vm1509_vm12 = vmand %vm4417_vm1, %vm1477_vm4 }
 0x18b   :  { %vm1484_vm8 = vcmp.eq.s32.totalorder %v1408_v56, 1  ;;  %v1573_v5 = vsel %vm1509_vm12, %v4418_v17, 0.0  ;;  %vm3929_vm2 = vmand %vm4423_vm9, %vm1486_vm11  ;;  %v4441_v17 = vld [vmem:[#allocation3_spill] sm:$0xff] }
 0x18c   :  { %vm3919_vm10 = vmand %vm4419_vm7, %vm1484_vm8  ;;  %v1732_v34 = vadd.f32 %v1731_v16, %v1573_v5  ;;  %v1582_v29 = vsel %vm3929_vm2, %v4426_v4, 0.0  ;;  %vm4433_vm2 = vcmp.eq.s32.totalorder %v4432_v31, %v3000_v61  ;;  %v4446_v4 = vld [vmem:[#allocation29_spill] sm:$0xff] }
 0x18d   :  { %v1580_v59 = vsel %vm3919_vm10, %v3431_v7, 0.0  ;;  %vm4428_vm10 = vcmp.eq.s32.totalorder %v4427_v6, %v3000_v61  ;;  %v4429_v7 = vld [vmem:[#allocation22_spill] sm:$0xff]  ;;  %v4453_v6 = vld [vmem:[#allocation5_spill] sm:$0xff] }
 0x18e   :  { %v1733_v55 = vadd.f32 %v1732_v34, %v1574_v27 }
 0x190   :  { %v1393_v42 = vpop.permute.xlu1 %1392  ;;  %v1423_v2 = vpop.permute.xlu2 %1422 }
 0x191   :  { %vm1479_vm7 = vcmp.eq.s32.totalorder %v1393_v42, 1  ;;  %vm1489_vm4 = vcmp.eq.s32.totalorder %v1423_v2, 1 }
 0x192   :  { %v1417_v16 = vpop.permute.xlu0 %1416  ;;  %vm1511_vm1 = vmand %vm4428_vm10, %vm1479_vm7  ;;  %vm4437_vm7 = vcmp.eq.s32.totalorder %v4348_v26, %v3000_v61 }
 0x193   :  { %vm1487_vm12 = vcmp.eq.s32.totalorder %v1417_v16, 1  ;;  %v1575_v62 = vsel %vm1511_vm1, %v4429_v7, 0.0  ;;  %vm3953_vm8 = vmand %vm4433_vm2, %vm1489_vm4 }
 0x194   :  { %vm3943_vm11 = vmand %vm1166_vm0, %vm1487_vm12  ;;  %v1734_v27 = vadd.f32 %v1733_v55, %v1575_v62  ;;  %v1585_v24 = vsel %vm3953_vm8, %v4436_v63, 0.0  ;;  %vm4442_vm12 = vcmp.eq.s32.totalorder %v4441_v17, %v3000_v61  ;;  %vm4447_vm8 = vcmp.eq.s32.totalorder %v4446_v4, %v3000_v61  ;;  %v4448_v55 = vld [vmem:[#allocation2_spill] sm:$0xff]  ;;  %v4457_v62 = vld [vmem:[#allocation8_spill] sm:$0xff] }
 0x195   :  { %v1583_v53 = vsel %vm3943_vm11, %v3508_v13, 0.0 }
 0x196   :  { %v1735_v12 = vadd.f32 %v1734_v27, %v1576_v21 }
 0x198   :  { %v1402_v44 = vpop.permute.xlu1 %1401  ;;  %v1736_v43 = vadd.f32 %v1735_v12, %v1577_v39  ;;  %v1432_v50 = vpop.permute.xlu2 %1431  ;;  %v4440_v39 = vld [vmem:[#allocation21_spill] sm:$0xff]  ;;  %v4458_v12 = vld [vmem:[#allocation26_spill] sm:$0xff] }
 0x199   :  { %vm1482_vm0 = vcmp.eq.s32.totalorder %v1402_v44, 1  ;;  %vm1492_vm9 = vcmp.eq.s32.totalorder %v1432_v50, 1  ;;  %v4460_v44 = vld [vmem:[#allocation41_spill] sm:$0xff] }
 0x19a   :  { %v1426_v41 = vpop.permute.xlu0 %1425  ;;  %vm1514_vm10 = vmand %vm4437_vm7, %vm1482_vm0 }
 0x19b   :  { %vm1490_vm1 = vcmp.eq.s32.totalorder %v1426_v41, 1  ;;  %v1578_v13 = vsel %vm1514_vm10, %v3496_v46, 0.0  ;;  %vm3977_vm11 = vmand %vm4442_vm12, %vm1492_vm9  ;;  %v4445_v46 = vld [vmem:[#allocation11_spill] sm:$0xff]  ;;  %vm4449_vm9 = vcmp.eq.s32.totalorder %v4369_v22, %v3000_v61 }
 0x19c   :  { %vm3967_vm4 = vmand %vm1169_vm3, %vm1490_vm1  ;;  %v1737_v21 = vadd.f32 %v1736_v43, %v1578_v13  ;;  %v1588_v32 = vsel %vm3977_vm11, %v4445_v46, 0.0  ;;  %vm4454_vm1 = vcmp.eq.s32.totalorder %v4453_v6, %v3000_v61  ;;  %v4463_v41 = vld [vmem:[#allocation27_spill] sm:$0xff] }
 0x19d   :  { %v1586_v56 = vsel %vm3967_vm4, %v4440_v39, 0.0 }
 0x19e   :  { %v1738_v5 = vadd.f32 %v1737_v21, %v1579_v45 }
 0x1a0   :  { %v1411_v18 = vpop.permute.xlu1 %1410  ;;  %v1739_v34 = vadd.f32 %v1738_v5, %v1580_v59  ;;  %v1441_v3 = vpop.permute.xlu2 %1440  ;;  %v4452_v59 = vld [vmem:[#allocation9_spill] sm:$0xff] }
 0x1a1   :  { %vm1485_vm3 = vcmp.eq.s32.totalorder %v1411_v18, 1  ;;  %vm1495_vm2 = vcmp.eq.s32.totalorder %v1441_v3, 1 }
 0x1a2   :  { %v1435_v51 = vpop.permute.xlu0 %1434  ;;  %vm1517_vm0 = vmand %vm4447_vm8, %vm1485_vm3  ;;  %vm4459_vm3 = vcmp.eq.s32.totalorder %v4458_v12, %v3000_v61 }
 0x1a3   :  { %vm1493_vm7 = vcmp.eq.s32.totalorder %v1435_v51, 1  ;;  %v1581_v42 = vsel %vm1517_vm0, %v4448_v55, 0.0  ;;  %vm4001_vm4 = vmand %vm4454_vm1, %vm1495_vm2 }
 0x1a4   :  { %vm3991_vm10 = vmand %vm4449_vm9, %vm1493_vm7  ;;  %v1740_v45 = vadd.f32 %v1739_v34, %v1581_v42  ;;  %v1591_v22 = vsel %vm4001_vm4, %v4457_v62, 0.0  ;;  %vm4464_vm7 = vcmp.eq.s32.totalorder %v4463_v41, %v3000_v61  ;;  %v1983_v34 = vmov 0.0  }
 0x1a5   :  { %v1589_v16 = vsel %vm3991_vm10, %v4452_v59, 0.0  ;;  %68 = vst [vmem:[%s4122_s5] sm:$0x3] %v1983_v34 }
 0x1a6   :  { %v1741_v52 = vadd.f32 %v1740_v45, %v1582_v29 }
 0x1a8   :  { %v1420_v27 = vpop.permute.xlu1 %1419  ;;  %v1742_v31 = vadd.f32 %v1741_v52, %v1583_v53  ;;  %v1450_v33 = vpop.permute.xlu2 %1449  ;;  %v1799_v52 = vrot.slane %v3910_v48, 4 }
 0x1a9   :  { %vm1488_vm12 = vcmp.eq.s32.totalorder %v1420_v27, 1  ;;  %vm1498_vm11 = vcmp.eq.s32.totalorder %v1450_v33, 1 }
 0x1aa   :  { %v1444_v63 = vpop.permute.xlu0 %1443  ;;  %vm1520_vm8 = vmand %vm4459_vm3, %vm1488_vm12 }
 0x1ab   :  { %vm1496_vm0 = vcmp.eq.s32.totalorder %v1444_v63, 1  ;;  %v1584_v43 = vsel %vm1520_vm8, %v4460_v44, 0.0  ;;  %vm4025_vm9 = vmand %vm4464_vm7, %vm1498_vm11  ;;  %vm4473_vm8 = vcmp.eq.s32.totalorder %v4394_v8, %v3800_v60 }
 0x1ac   :  { %vm4015_vm2 = vmand %vm1175_vm6, %vm1496_vm0  ;;  %v1743_v29 = vadd.f32 %v1742_v31, %v1584_v43  ;;  %v1594_v36 = vsel %vm4025_vm9, %v4467_v25, 0.0  ;;  %vm4479_vm9 = vcmp.eq.s32.totalorder %v4392_v37, %v3800_v60  ;;  %v1807_v13 = vld [vmem:[%s4122_s5] sm:$0x3] }
 0x1ad   :  { %v1592_v53 = vsel %vm4015_vm2, %v3714_v38, 0.0  ;;  %vm4476_vm2 = vcmp.eq.s32.totalorder %v4385_v28, %v3000_v61 }
 0x1ae   :  { %v1744_v21 = vadd.f32 %v1743_v29, %v1585_v24 }
 0x1b0   :  { %v1429_v39 = vpop.permute.xlu1 %1428  ;;  %v1745_v17 = vadd.f32 %v1744_v21, %v1586_v56 }
 0x1b1   :  { %v1459_v26 = vpop.permute.xlu2 %1458  ;;  %vm1491_vm6 = vcmp.eq.s32.totalorder %v1429_v39, 1 }
 0x1b2   :  { %v1453_v46 = vpop.permute.xlu0 %1452  ;;  %vm1501_vm10 = vcmp.eq.s32.totalorder %v1459_v26, 1  ;;  %vm1523_vm1 = vmand %vm1170_vm15, %vm1491_vm6 }
 0x1b3   :  { %vm1499_vm4 = vcmp.eq.s32.totalorder %v1453_v46, 1  ;;  %v1587_v38 = vsel %vm1523_vm1, %v3702_v57, 0.0  ;;  %vm4049_vm11 = vmand %vm1180_vm13, %vm1501_vm10  ;;  %v4472_v57 = vld [vmem:[#allocation17_spill] sm:$0xff]  ;;  %vm4480_vm1 = vcmp.eq.s32.totalorder %v4400_v1, %v3800_v60 }
 0x1b4   :  { %vm4039_vm12 = vmand %vm1178_vm14, %vm1499_vm4  ;;  %v1746_v24 = vadd.f32 %v1745_v17, %v1587_v38  ;;  %v1597_v14 = vsel %vm4049_vm11, %v4472_v57, 0.0  ;;  %vm4483_vm11 = vcmp.eq.s32.totalorder %v4398_v49, %v3800_v60  ;;  %v1800_v49 = vadd.f32 %v1799_v52, %v3910_v48 }
 0x1b5   :  { %v1595_v56 = vsel %vm4039_vm12, %v3760_v9, 0.0 }
 0x1b6   :  { %v1747_v18 = vadd.f32 %v1746_v24, %v1588_v32  ;;  %v1801_v12 = vrot.slane %v1800_v49, 2 }
 0x1b8   :  { %v1438_v3 = vpop.permute.xlu1 %1437  ;;  %v1748_v51 = vadd.f32 %v1747_v18, %v1589_v16  ;;  %v1802_v43 = vadd.f32 %v1801_v12, %v1800_v49 }
 0x1b9   :  { %vm1494_vm14 = vcmp.eq.s32.totalorder %v1438_v3, 1 }
 0x1ba   :  { %v1468_v9 = vpop.permute.xlu2 %1467  ;;  %v1462_v4 = vpop.permute.xlu0 %1461  ;;  %vm1526_vm13 = vmand %vm1173_vm5, %vm1494_vm14  ;;  %v1803_v29 = vrot.slane %v1802_v43, 1 }
 0x1bb   :  { %vm1504_vm15 = vcmp.eq.s32.totalorder %v1468_v9, 1  ;;  %vm1502_vm3 = vcmp.eq.s32.totalorder %v1462_v4, 1  ;;  %v1590_v23 = vsel %vm1526_vm13, %v3754_v40, 0.0  ;;  %vm4484_vm13 = vcmp.eq.s32.totalorder %v4404_v20, %v3800_v60 }
 0x1bc   :  { %vm4066_vm0 = vmand %vm4473_vm8, %vm1502_vm3  ;;  %v1749_v55 = vadd.f32 %v1748_v51, %v1590_v23  ;;  %v1804_v48 = vadd.f32 %v1803_v29, %v1802_v43 }
 0x1bd   :  { %v1598_v42 = vsel %vm4066_vm0, %v3805_v0, 0.0  ;;  %vm4076_vm7 = vmand %vm4476_vm2, %vm1504_vm15  ;;  %vm4485_vm0 = vcmp.eq.s32.totalorder %v4412_v54, %v3800_v60 }
 0x1be   :  { %v1600_v40 = vsel %vm4076_vm7, %v3757_v10, 0.0  ;;  %v1750_v8 = vadd.f32 %v1749_v55, %v1591_v22  ;;  %vm1805_vm7 = vcmask 1040384  }
 0x1c0   :  { %v1447_v2 = vpop.permute.xlu1 %1446  ;;  %v1751_v45 = vadd.f32 %v1750_v8, %v1592_v53 }
 0x1c1   :  { %vm1497_vm5 = vcmp.eq.s32.totalorder %v1447_v2, 1 }
 0x1c2   :  { %v1471_v59 = vpop.permute.xlu0 %1470  ;;  %vm1529_vm6 = vmand %vm4479_vm9, %vm1497_vm5 }
 0x1c3   :  { %vm1505_vm10 = vcmp.eq.s32.totalorder %v1471_v59, 1  ;;  %v1593_v61 = vsel %vm1529_vm6, %v3787_v19, 0.0 }
 0x1c4   :  { %vm4090_vm4 = vmand %vm4480_vm1, %vm1505_vm10  ;;  %v1752_v10 = vadd.f32 %v1751_v45, %v1593_v61 }
 0x1c5   :  { %v1601_v0 = vsel %vm4090_vm4, %v3841_v11, 0.0 }
 0x1c6   :  { %v1753_v16 = vadd.f32 %v1752_v10, %v1594_v36 }
 0x1c8   :  { %v1754_v7 = vadd.f32 %v1753_v16, %v1595_v56 }
 0x1c9   :  { %v1456_v6 = vpop.permute.xlu1 %1455 }
 0x1ca   :  { %vm1500_vm12 = vcmp.eq.s32.totalorder %v1456_v6, 1 }
 0x1cb   :  { %vm1532_vm14 = vmand %vm4483_vm11, %vm1500_vm12 }
 0x1cc   :  { %v1596_v19 = vsel %vm1532_vm14, %v3828_v15, 0.0 }
 0x1cd   :  { %v1755_v37 = vadd.f32 %v1754_v7, %v1596_v19 }
 0x1cf   :  { %v1756_v1 = vadd.f32 %v1755_v37, %v1597_v14 }
 0x1d1   :  { %v1757_v22 = vadd.f32 %v1756_v1, %v1598_v42 }
 0x1d2   :  { %v1465_v62 = vpop.permute.xlu1 %1464 }
 0x1d3   :  { %vm1503_vm15 = vcmp.eq.s32.totalorder %v1465_v62, 1 }
 0x1d4   :  { %vm1535_vm3 = vmand %vm4484_vm13, %vm1503_vm15 }
 0x1d5   :  { %v1599_v11 = vsel %vm1535_vm3, %v3860_v30, 0.0 }
 0x1d6   :  { %v1758_v27 = vadd.f32 %v1757_v22, %v1599_v11 }
 0x1d8   :  { %v1759_v31 = vadd.f32 %v1758_v27, %v1600_v40 }
 0x1da   :  { %v1474_v33 = vpop.permute.xlu1 %1473  ;;  %v1760_v63 = vadd.f32 %v1759_v31, %v1601_v0 }
 0x1db   :  { %vm1506_vm8 = vcmp.eq.s32.totalorder %v1474_v33, 1 }
 0x1dc   :  { %vm1538_vm2 = vmand %vm4485_vm0, %vm1506_vm8 }
 0x1dd   :  { %v1602_v15 = vsel %vm1538_vm2, %v3883_v58, 0.0 }
 0x1de   :  { %v1761_v20 = vadd.f32 %v1760_v63, %v1602_v15 }
 0x1e0   :  { %v1762_v44 = vrot.slane %v1761_v20, 4 }
 0x1e2   :  { %v1763_v30 = vadd.f32 %v1762_v44, %v1761_v20 }
 0x1e4   :  { %v1764_v50 = vrot.slane %v1763_v30, 2 }
 0x1e6   :  { %v1765_v53 = vadd.f32 %v1764_v50, %v1763_v30 }
 0x1e8   :  { %v1766_v41 = vrot.slane %v1765_v53, 1 }
 0x1ea   :  { %v1767_v25 = vadd.f32 %v1766_v41, %v1765_v53 }
 0x1ec   :  { %v1806_v60 = vsel %vm1805_vm7, %v1767_v25, %v1804_v48 }
 0x1ed   :  { %v1808_v54 = vadd.f32 %v1807_v13, %v1806_v60 }
 0x1ef   :  { %1809 = vst [vmem:[%s4122_s5] sm:$0x3] %v1808_v54 }

</bundles_post_ra>
